<compile_context>
chip_gen: v7x
topology: tpu7x:2x2x1
jax: 0.10.0
libtpu: 0.0.40
codegen_flags: <defaults>
</compile_context>

<pallas_src>
import functools
import math

import jax
import jax.numpy as jnp
from jax import lax
from jax.experimental import pallas as pl
from jax.experimental.pallas import tpu as pltpu

_BN_EPS = 1e-5
_COMPUTE_DTYPE = jnp.bfloat16


def _round_up(x, m):
    return ((x + m - 1) // m) * m


def _largest_divisor(n, candidates):
    return next(t for t in candidates if n % t == 0)


# ------------------------------------------------------------------
# Fused matmul kernel:  out = epi( prologue(A) @ B )
#   prologue(A) = relu(A * p_scale + p_shift)   (per-K column, optional)
#   epi(Y)      = relu(Y * e_scale + e_shift)   (per-N column, optional)
# A/B are cast to bf16 for the MXU; accumulation is f32 in VMEM scratch.
# ------------------------------------------------------------------
def _mm_kernel(*refs, has_pro, pro_relu, has_epi, epi_relu):
    a_ref, b_ref = refs[0], refs[1]
    idx = 2
    if has_pro:
        ps_ref, pt_ref = refs[idx], refs[idx + 1]
        idx += 2
    if has_epi:
        es_ref, et_ref = refs[idx], refs[idx + 1]
        idx += 2
    o_ref, acc_ref = refs[idx], refs[idx + 1]

    @pl.when(pl.program_id(2) == 0)
    def _():
        acc_ref[...] = jnp.zeros_like(acc_ref)

    a = a_ref[...]
    if has_pro:
        a = a.astype(jnp.float32) * ps_ref[...] + pt_ref[...]
        if pro_relu:
            a = jnp.maximum(a, 0.0)
    a = a.astype(jnp.bfloat16)
    b = b_ref[...].astype(jnp.bfloat16)
    acc_ref[...] += jnp.dot(a, b, preferred_element_type=jnp.float32)

    @pl.when(pl.program_id(2) == pl.num_programs(2) - 1)
    def _():
        out = acc_ref[...]
        if has_epi:
            out = out * es_ref[...] + et_ref[...]
            if epi_relu:
                out = jnp.maximum(out, 0.0)
        o_ref[...] = out.astype(o_ref.dtype)


def fused_matmul(a, b, *, pro=None, pro_relu=False, epi=None, epi_relu=False,
                 out_dtype=_COMPUTE_DTYPE):
    """(Ma, Ka) x (K, Nb) -> (Ma, Nb) using only the first K columns of `a` (Ka >= K).

    When Ka > K (dense-block slab mode) the extra columns of `a` must be benign (zeros);
    B rows / prologue entries beyond the valid channels are zero-padded by the caller.
    """
    Ma, Ka = a.shape
    K, Nb = b.shape
    assert Ka >= K, (Ka, K)

    Mp = _round_up(Ma, 8)
    tm = _largest_divisor(Mp, (256, 128, 64, 32, 16, 8))
    Np = _round_up(Nb, 128)
    tn = 256 if Np % 256 == 0 else 128
    Kp = _round_up(K, 128)
    tk = _largest_divisor(Kp, (512, 256, 128))

    a_use = a
    if Ka >= Kp:                                   # aligned / slab: never copy along K
        if Mp != Ma:
            a_use = jnp.pad(a, ((0, Mp - Ma), (0, 0)))
    else:
        a_use = jnp.pad(a, ((0, Mp - Ma), (0, Kp - Ka)))
    b_use = b.astype(_COMPUTE_DTYPE)
    if (K, Nb) != (Kp, Np):
        b_use = jnp.pad(b_use, ((0, Kp - K), (0, Np - Nb)))

    inputs = [a_use, b_use]
    in_specs = [pl.BlockSpec((tm, tk), lambda i, j, k: (i, k)),
                pl.BlockSpec((tk, tn), lambda i, j, k: (k, j))]
    if pro is not None:
        for v in pro:
            v = jnp.asarray(v, jnp.float32)
            inputs.append(jnp.pad(v, (0, Kp - v.shape[0])).reshape(1, Kp))
            in_specs.append(pl.BlockSpec((1, tk), lambda i, j, k: (0, k)))
    if epi is not None:
        for v in epi:
            v = jnp.asarray(v, jnp.float32)
            inputs.append(jnp.pad(v, (0, Np - v.shape[0])).reshape(1, Np))
            in_specs.append(pl.BlockSpec((1, tn), lambda i, j, k: (0, j)))

    kernel = functools.partial(_mm_kernel, has_pro=pro is not None, pro_relu=pro_relu,
                               has_epi=epi is not None, epi_relu=epi_relu)
    cost = pl.CostEstimate(
        flops=2 * Mp * Np * Kp, transcendentals=0,
        bytes_accessed=int(Mp * Kp * a_use.dtype.itemsize + Kp * Np * 2
                           + Mp * Np * jnp.dtype(out_dtype).itemsize))
    out = pl.pallas_call(
        kernel,
        out_shape=jax.ShapeDtypeStruct((Mp, Np), out_dtype),
        grid_spec=pltpu.PrefetchScalarGridSpec(
            num_scalar_prefetch=0,
            grid=(Mp // tm, Np // tn, Kp // tk),
            in_specs=in_specs,
            out_specs=pl.BlockSpec((tm, tn), lambda i, j, k: (i, j)),
            scratch_shapes=[pltpu.VMEM((tm, tn), jnp.float32)]),
        compiler_params=pltpu.CompilerParams(
            dimension_semantics=("parallel", "parallel", "arbitrary")),
        cost_estimate=cost,
    )(*inputs)
    return out[:Ma, :Nb]


# ------------------------------------------------------------------
# Row-tiled window-reduction kernels (max-pool / avg-pool / global avg-pool)
# ------------------------------------------------------------------
def _pool_max_kernel(x_ref, o_ref):        # (KK, tr, C) -> (tr, C)
    o_ref[...] = jnp.max(x_ref[...], axis=0)


def _pool_mean_kernel(x_ref, o_ref):       # (KK, tr, C) -> (tr, C), mean in f32
    o_ref[...] = jnp.mean(x_ref[...].astype(jnp.float32), axis=0).astype(o_ref.dtype)


def _window_pool(stacked, kind, out_dtype):
    KK, R, C = stacked.shape
    Rp = _round_up(R, 8)
    if Rp != R:
        stacked = jnp.pad(stacked, ((0, 0), (0, Rp - R), (0, 0)))
    tr = _largest_divisor(Rp, (512, 256, 128, 64, 32, 16, 8))
    kernel = _pool_max_kernel if kind == "max" else _pool_mean_kernel
    out = pl.pallas_call(
        kernel,
        out_shape=jax.ShapeDtypeStruct((Rp, C), out_dtype),
        grid_spec=pltpu.PrefetchScalarGridSpec(
            num_scalar_prefetch=0,
            grid=(Rp // tr,),
            in_specs=[pl.BlockSpec((KK, tr, C), lambda i: (0, i, 0))],
            out_specs=pl.BlockSpec((tr, C), lambda i: (i, 0))),
        compiler_params=pltpu.CompilerParams(dimension_semantics=("parallel",)),
    )(stacked)
    return out[:R]


def max_pool_3x3_s2_p1(x4):
    N, H, W, C = x4.shape
    Ho, Wo = (H + 2 - 3) // 2 + 1, (W + 2 - 3) // 2 + 1
    # Input is post-ReLU (>= 0), so zero padding is equivalent to -inf padding for max.
    xp = jnp.pad(x4, ((0, 0), (1, 1), (1, 1), (0, 0)))
    wins = [xp[:, kh:kh + 2 * Ho:2, kw:kw + 2 * Wo:2, :] for kh in range(3) for kw in range(3)]
    stacked = jnp.stack(wins, 0).reshape(9, N * Ho * Wo, C)
    return _window_pool(stacked, "max", x4.dtype).reshape(N, Ho, Wo, C)


def avg_pool_2x2_s2(x4):
    N, H, W, C = x4.shape
    Ho, Wo = H // 2, W // 2
    wins = [x4[:, kh:kh + 2 * Ho:2, kw:kw + 2 * Wo:2, :] for kh in range(2) for kw in range(2)]
    stacked = jnp.stack(wins, 0).reshape(4, N * Ho * Wo, C)
    return _window_pool(stacked, "mean", x4.dtype).reshape(N, Ho, Wo, C)


def global_avg_pool(x4):
    """AdaptiveAvgPool2d(1) + view(N, C); returns f32."""
    N, H, W, C = x4.shape
    stacked = jnp.transpose(x4.reshape(N, H * W, C), (1, 0, 2))    # (HW, N, C), small map
    return _window_pool(stacked, "mean", jnp.float32)              # (N, C)


# ------------------------------------------------------------------
# Convolution wrappers (im2col glue; compute on the fused matmul kernel)
# ------------------------------------------------------------------
def _im2col(x4, KH, KW, stride, padding):
    N, H, W, C = x4.shape
    Ho = (H + 2 * padding - KH) // stride + 1
    Wo = (W + 2 * padding - KW) // stride + 1
    xp = x4 if padding == 0 else jnp.pad(
        x4, ((0, 0), (padding, padding), (padding, padding), (0, 0)))
    cols = [xp[:, kh:kh + stride * Ho:stride, kw:kw + stride * Wo:stride, :]
            for kh in range(KH) for kw in range(KW)]
    a = jnp.concatenate(cols, axis=-1).reshape(N * Ho * Wo, KH * KW * C)   # (kh, kw, c) order
    return a, Ho, Wo


def conv2d_mat(x4, wmat, ksize, stride, padding, *, pro=None, pro_relu=False,
               epi=None, epi_relu=False, out_dtype=_COMPUTE_DTYPE):
    """Conv2d (bias=False) with weights pre-flattened to (KH*KW*Cin, O)."""
    N, H, W, C = x4.shape
    KH, KW = ksize
    if KH == 1 and KW == 1 and stride == 1 and padding == 0:
        a, Ho, Wo = x4.reshape(N * H * W, C), H, W          # 1x1 fast path: no im2col
    else:
        a, Ho, Wo = _im2col(x4, KH, KW, stride, padding)
    y = fused_matmul(a, wmat, pro=pro, pro_relu=pro_relu, epi=epi, epi_relu=epi_relu,
                     out_dtype=out_dtype)
    return y.reshape(N, Ho, Wo, wmat.shape[1])


# ------------------------------------------------------------------
# Parameter construction (deterministic, synthetic) — same layout as before
# ------------------------------------------------------------------
def _bn_params(key, c):
    k1, k2, k3, k4 = jax.random.split(key, 4)
    return dict(
        gamma=1.0 + 0.1 * jax.random.normal(k1, (c,), jnp.float32),
        beta=0.1 * jax.random.normal(k2, (c,), jnp.float32),
        mean=0.1 * jax.random.normal(k3, (c,), jnp.float32),
        var=0.9 + 0.2 * jax.random.uniform(k4, (c,), jnp.float32),
    )


def _conv_params(key, out_c, in_c, kh, kw):
    fan_in = in_c * kh * kw
    return jax.random.normal(key, (out_c, in_c, kh, kw), jnp.float32) / math.sqrt(fan_in)


def init_densenet_model(key, *, embedding_dim, num_classes, growth_rate,
                        block_config, num_init_features, bn_size=4):
    keys = iter(jax.random.split(key, 4096))
    feats = {}
    feats["conv0"] = _conv_params(next(keys), num_init_features, 3, 7, 7)
    feats["norm0"] = _bn_params(next(keys), num_init_features)
    ch = num_init_features
    for bi, nlayers in enumerate(block_config):
        for li in range(nlayers):
            p = {
                "norm1": _bn_params(next(keys), ch),
                "conv1": _conv_params(next(keys), bn_size * growth_rate, ch, 1, 1),
                "norm2": _bn_params(next(keys), bn_size * growth_rate),
                "conv2": _conv_params(next(keys), growth_rate, bn_size * growth_rate, 3, 3),
            }
            feats[f"block{bi}_layer{li}"] = p
            ch += growth_rate
        if bi != len(block_config) - 1:
            feats[f"trans{bi}"] = {
                "norm": _bn_params(next(keys), ch),
                "conv": _conv_params(next(keys), ch // 2, ch, 1, 1),
            }
            ch = ch // 2
    feats["norm5"] = _bn_params(next(keys), ch)
    num_features = ch    # == self.output_conv from _get_output_conv()

    params = dict(
        features=feats,
        classifier_w=jax.random.normal(next(keys), (embedding_dim, num_features),
                                       jnp.float32) / math.sqrt(num_features),
        classifier_b=0.1 * jax.random.normal(next(keys), (embedding_dim,), jnp.float32),
        bn=_bn_params(next(keys), embedding_dim),
        # classification_layer exists in __init__ but is unused by forward():
        classification_w=jax.random.normal(next(keys), (num_classes, embedding_dim),
                                           jnp.float32) / math.sqrt(embedding_dim),
        classification_b=jnp.zeros((num_classes,), jnp.float32),
    )
    return params, num_features


# ------------------------------------------------------------------
# Parameter prep (run once, outside jit): matmul-layout bf16 weights, precomputed
# BN scale/shift, per-layer zero-padded slab weights, folded classifier.
# ------------------------------------------------------------------
def _bn_scale_shift(bn):
    scale = bn["gamma"] / jnp.sqrt(bn["var"] + _BN_EPS)
    shift = bn["beta"] - bn["mean"] * scale
    return scale.astype(jnp.float32), shift.astype(jnp.float32)


def _conv_w_to_mat(w_oihw, dtype=_COMPUTE_DTYPE):
    O, Cin, KH, KW = w_oihw.shape
    return jnp.transpose(w_oihw, (2, 3, 1, 0)).reshape(KH * KW * Cin, O).astype(dtype)


def prepare_params(params, *, block_config, growth_rate, num_init_features, bn_size):
    feats = params["features"]
    pp = {"conv0_w": _conv_w_to_mat(feats["conv0"]),
          "conv0_epi": _bn_scale_shift(feats["norm0"])}
    blocks, trans = [], []
    ch = num_init_features
    for bi, nlayers in enumerate(block_config):
        layers = []
        for li in range(nlayers):
            p = feats[f"block{bi}_layer{li}"]
            cur = ch + li * growth_rate
            Kp = _round_up(cur, 128)                       # slab-aligned K extent
            s1, t1 = _bn_scale_shift(p["norm1"])
            w1 = jnp.pad(_conv_w_to_mat(p["conv1"]), ((0, Kp - cur), (0, 0)))
            s1 = jnp.pad(s1, (0, Kp - cur))
            t1 = jnp.pad(t1, (0, Kp - cur))
            layers.append(dict(
                w1=w1, pro1=(s1, t1),
                epi1=_bn_scale_shift(p["norm2"]),
                w2=_conv_w_to_mat(p["conv2"])))
        ch += nlayers * growth_rate
        blocks.append(dict(layers=layers))
        if bi != len(block_config) - 1:
            t = feats[f"trans{bi}"]
            Kp = _round_up(ch, 128)
            s, sh = _bn_scale_shift(t["norm"])
            trans.append(dict(
                w=jnp.pad(_conv_w_to_mat(t["conv"]), ((0, Kp - ch), (0, 0))),
                pro=(jnp.pad(s, (0, Kp - ch)), jnp.pad(sh, (0, Kp - ch)))))
            ch = ch // 2
        else:
            trans.append(None)

    # Fold norm5 (per-channel affine commutes with global avg pool) and the eval-mode
    # BatchNorm1d into the classifier Linear.
    s5, t5 = _bn_scale_shift(feats["norm5"])
    sb, tb = _bn_scale_shift(params["bn"])
    W = params["classifier_w"].astype(jnp.float32)          # (E, F)
    b = params["classifier_b"].astype(jnp.float32)
    pp["cls_w"] = ((sb[:, None] * W) * s5[None, :]).T        # (F, E), pre-transposed
    pp["cls_b"] = sb * (W @ t5 + b) + tb
    pp["blocks"] = blocks
    pp["trans"] = trans
    return pp


# ------------------------------------------------------------------
# Forward pass (matches DenseNetModels.forward, eval mode)
# ------------------------------------------------------------------
def densenet_models_forward(pp, x_nchw):
    x = jnp.transpose(x_nchw, (0, 2, 3, 1)).astype(_COMPUTE_DTYPE)   # NCHW -> NHWC

    # conv0 (7x7/s2) with norm0+ReLU fused as epilogue, then 3x3/s2 max-pool
    x = conv2d_mat(x, pp["conv0_w"], (7, 7), 2, 3, epi=pp["conv0_epi"], epi_relu=True)
    x = max_pool_3x3_s2_p1(x)

    for bi, bp in enumerate(pp["blocks"]):
        layers = bp["layers"]
        N, H, W, Cin = x.shape
        M = N * H * W
        C_total = Cin + sum(lp["w2"].shape[1] for lp in layers)
        slab_C = _round_up(C_total, 128)
        Mp = _round_up(M, 256) if M >= 256 else _round_up(M, 8)
        # Pre-allocated dense-block channel slab (rows padded once for big MXU tiles);
        # replaces the per-layer jnp.concatenate of the growing feature map.
        slab = jnp.zeros((Mp, slab_C), _COMPUTE_DTYPE)
        slab = lax.dynamic_update_slice(slab, x.reshape(M, Cin), (0, 0))
        cur = Cin
        for lp in layers:
            growth = lp["w2"].shape[1]
            # 1x1 bottleneck conv reading the slab directly:
            #   prologue = norm1+ReLU (unwritten slab channels have zero scale/shift/weights),
            #   epilogue = norm2+ReLU.
            y = fused_matmul(slab, lp["w1"], pro=lp["pro1"], pro_relu=True,
                             epi=lp["epi1"], epi_relu=True)
            y4 = y[:M].reshape(N, H, W, -1)
            # 3x3 conv producing `growth` new channels, written in place at its offset.
            y2 = conv2d_mat(y4, lp["w2"], (3, 3), 1, 1)
            slab = lax.dynamic_update_slice(slab, y2.reshape(M, growth), (0, cur))
            cur += growth
        tp = pp["trans"][bi]
        if tp is not None:
            # transition: norm+ReLU fused as prologue of the 1x1 conv, then 2x2 avg-pool
            t = fused_matmul(slab, tp["w"], pro=tp["pro"], pro_relu=True)
            x = avg_pool_2x2_s2(t[:M].reshape(N, H, W, -1))
        else:
            x = slab[:M, :C_total].reshape(N, H, W, C_total)

    # model.features ends at norm5 (no trailing ReLU); norm5 + BatchNorm1d are folded into
    # cls_w/cls_b, and the Linear bias is applied as the matmul epilogue shift.
    pooled = global_avg_pool(x)                                     # (N, num_features) f32
    out = fused_matmul(pooled, pp["cls_w"],
                       epi=(jnp.ones_like(pp["cls_b"]), pp["cls_b"]),
                       out_dtype=jnp.float32)
    return out
    # TODO(synk): dropout / classification_layer exist in __init__ but are not on forward()'s path.


# ------------------------------------------------------------------
if __name__ == "__main__":
    # densenet121 config = growth 32, blocks (6,12,24,16), init 64; scaled down here for speed.
    growth_rate, block_config, num_init_features, bn_size = 8, (2, 2), 16, 4
    embedding_dim, num_classes, image_size, batch = 32, 10, 16, 2

    key = jax.random.PRNGKey(0)
    kp, kx = jax.random.split(key)
    params, num_features = init_densenet_model(
        kp, embedding_dim=embedding_dim, num_classes=num_classes,
        growth_rate=growth_rate, block_config=block_config,
        num_init_features=num_init_features, bn_size=bn_size)

    prepped = prepare_params(params, block_config=block_config, growth_rate=growth_rate,
                             num_init_features=num_init_features, bn_size=bn_size)

    x = jax.random.normal(kx, (batch, 3, image_size, image_size), jnp.float32)

    fwd = jax.jit(densenet_models_forward)
    out = fwd(prepped, x)
    jax.block_until_ready(out)

    assert out.shape == (batch, embedding_dim), out.shape
    assert out.dtype == jnp.float32
    print("KERNEL_OK")
</pallas_src>

<mosaic_0001>
module attributes {stable_mosaic.version = 11 : i64} {
  func.func @_mm_kernel(%arg0: i32, %arg1: i32, %arg2: i32, %arg3: memref<128x256xbf16, #tpu.memory_space<vmem>>, %arg4: memref<256x128xbf16, #tpu.memory_space<vmem>>, %arg5: memref<1x128xf32, #tpu.memory_space<vmem>>, %arg6: memref<1x128xf32, #tpu.memory_space<vmem>>, %arg7: memref<128x128xbf16, #tpu.memory_space<vmem>>, %arg8: memref<128x128xf32, #tpu.memory_space<vmem>>) attributes {dimension_semantics = [#tpu.dimension_semantics<parallel>, #tpu.dimension_semantics<parallel>, #tpu.dimension_semantics<arbitrary>], iteration_bounds = array<i64: 1, 1, 1>, scalar_prefetch = 0 : i64, scratch_operands = 1 : i64, tpu.core_type = #tpu.core_type<tc>, window_params = [{transform_indices = @transform_0, window_bounds = array<i64: 128, 256>}, {transform_indices = @transform_1, window_bounds = array<i64: 256, 128>}, {transform_indices = @transform_2, window_bounds = array<i64: 1, 128>}, {transform_indices = @transform_3, window_bounds = array<i64: 1, 128>}, {transform_indices = @transform_4, window_bounds = array<i64: 128, 128>}]} {
    %c0_i32 = arith.constant 0 : i32
    %0 = arith.cmpi eq, %arg2, %c0_i32 : i32
    %1 = arith.extui %0 : i1 to i32
    %c0_i32_0 = arith.constant 0 : i32
    %2 = arith.cmpi ne, %1, %c0_i32_0 : i32
    scf.if %2 {
      %cst_10 = arith.constant 0.000000e+00 : f32
      %12 = vector.broadcast %cst_10 : f32 to vector<128x128xf32>
      %c0_11 = arith.constant 0 : index
      %c0_12 = arith.constant 0 : index
      %13 = vector.load %arg8[%c0_11, %c0_12] : memref<128x128xf32, #tpu.memory_space<vmem>>, vector<128x128xf32>
      tpu.vector_store %arg8[%c0_11, %c0_12], %12 {strides = array<i32>} : memref<128x128xf32, #tpu.memory_space<vmem>>, vector<128x128xf32>,
    } else {
    }
    %c0 = arith.constant 0 : index
    %c0_1 = arith.constant 0 : index
    %3 = vector.load %arg3[%c0, %c0_1] : memref<128x256xbf16, #tpu.memory_space<vmem>>, vector<128x256xbf16>
    %c0_2 = arith.constant 0 : index
    %c0_3 = arith.constant 0 : index
    %4 = vector.load %arg4[%c0_2, %c0_3] : memref<256x128xbf16, #tpu.memory_space<vmem>>, vector<256x128xbf16>
    %c0_4 = arith.constant 0 : index
    %c0_5 = arith.constant 0 : index
    %5 = vector.load %arg8[%c0_4, %c0_5] : memref<128x128xf32, #tpu.memory_space<vmem>>, vector<128x128xf32>
    %cst = arith.constant dense<0.000000e+00> : vector<128x128xf32>
    %6 = tpu.matmul %3, %4, %cst {dimension_numbers = #tpu.dot_dimension_numbers<[1], [0], [0], [1], [0, 0, 1, 1], [], []>} : vector<128x256xbf16>, vector<256x128xbf16>, vector<128x128xf32> -> vector<128x128xf32>
    %7 = arith.addf %5, %6 : vector<128x128xf32>
    %c0_6 = arith.constant 0 : index
    %c0_7 = arith.constant 0 : index
    %8 = vector.load %arg8[%c0_6, %c0_7] : memref<128x128xf32, #tpu.memory_space<vmem>>, vector<128x128xf32>
    tpu.vector_store %arg8[%c0_6, %c0_7], %7 {strides = array<i32>} : memref<128x128xf32, #tpu.memory_space<vmem>>, vector<128x128xf32>,
    %c0_i32_8 = arith.constant 0 : i32
    %9 = arith.cmpi eq, %arg2, %c0_i32_8 : i32
    %10 = arith.extui %9 : i1 to i32
    %c0_i32_9 = arith.constant 0 : i32
    %11 = arith.cmpi ne, %10, %c0_i32_9 : i32
    scf.if %11 {
      %c0_10 = arith.constant 0 : index
      %c0_11 = arith.constant 0 : index
      %12 = vector.load %arg8[%c0_10, %c0_11] : memref<128x128xf32, #tpu.memory_space<vmem>>, vector<128x128xf32>
      %c0_12 = arith.constant 0 : index
      %c0_13 = arith.constant 0 : index
      %13 = vector.load %arg5[%c0_12, %c0_13] : memref<1x128xf32, #tpu.memory_space<vmem>>, vector<1x128xf32>
      %14 = vector.broadcast %13 : vector<1x128xf32> to vector<128x128xf32>
      %15 = arith.mulf %12, %14 : vector<128x128xf32>
      %c0_14 = arith.constant 0 : index
      %c0_15 = arith.constant 0 : index
      %16 = vector.load %arg6[%c0_14, %c0_15] : memref<1x128xf32, #tpu.memory_space<vmem>>, vector<1x128xf32>
      %17 = vector.broadcast %16 : vector<1x128xf32> to vector<128x128xf32>
      %18 = arith.addf %15, %17 : vector<128x128xf32>
      %cst_16 = arith.constant 0.000000e+00 : f32
      %19 = vector.broadcast %cst_16 : f32 to vector<128x128xf32>
      %20 = arith.maximumf %18, %19 : vector<128x128xf32>
      %21 = arith.truncf %20 : vector<128x128xf32> to vector<128x128xbf16>
      %c0_17 = arith.constant 0 : index
      %c0_18 = arith.constant 0 : index
      %22 = vector.load %arg7[%c0_17, %c0_18] : memref<128x128xbf16, #tpu.memory_space<vmem>>, vector<128x128xbf16>
      tpu.vector_store %arg7[%c0_17, %c0_18], %21 {strides = array<i32>} : memref<128x128xbf16, #tpu.memory_space<vmem>>, vector<128x128xbf16>,
    } else {
    }
    return
  }
  func.func @transform_0(%arg0: i32, %arg1: i32, %arg2: i32) -> (i32, i32) {
    %c0_i32 = arith.constant 0 : i32
    return %arg0, %arg2 : i32, i32
  }
  func.func @transform_1(%arg0: i32, %arg1: i32, %arg2: i32) -> (i32, i32) {
    %c0_i32 = arith.constant 0 : i32
    return %arg2, %arg1 : i32, i32
  }
  func.func @transform_2(%arg0: i32, %arg1: i32, %arg2: i32) -> (i32, i32) {
    %c0_i32 = arith.constant 0 : i32
    %c0_i32_0 = arith.constant 0 : i32
    return %c0_i32, %arg1 : i32, i32
  }
  func.func @transform_3(%arg0: i32, %arg1: i32, %arg2: i32) -> (i32, i32) {
    %c0_i32 = arith.constant 0 : i32
    %c0_i32_0 = arith.constant 0 : i32
    return %c0_i32, %arg1 : i32, i32
  }
  func.func @transform_4(%arg0: i32, %arg1: i32, %arg2: i32) -> (i32, i32) {
    %c0_i32 = arith.constant 0 : i32
    return %arg0, %arg1 : i32, i32
  }
}

module attributes {stable_mosaic.version = 11 : i64} {
  func.func @_pool_max_kernel(%arg0: i32, %arg1: memref<9x32x16xbf16, #tpu.memory_space<vmem>>, %arg2: memref<32x16xbf16, #tpu.memory_space<vmem>>) attributes {dimension_semantics = [#tpu.dimension_semantics<parallel>], iteration_bounds = array<i64: 1>, scalar_prefetch = 0 : i64, scratch_operands = 0 : i64, tpu.core_type = #tpu.core_type<tc>, window_params = [{transform_indices = @transform_0, window_bounds = array<i64: 9, 32, 16>}, {transform_indices = @transform_1, window_bounds = array<i64: 32, 16>}]} {
    %c0 = arith.constant 0 : index
    %c0_0 = arith.constant 0 : index
    %c0_1 = arith.constant 0 : index
    %0 = vector.load %arg1[%c0, %c0_0, %c0_1] : memref<9x32x16xbf16, #tpu.memory_space<vmem>>, vector<9x32x16xbf16>
    %cst = arith.constant dense<0xFF80> : vector<32x16xbf16>
    %1 = vector.multi_reduction <maximumf>, %0, %cst [0] : vector<9x32x16xbf16> to vector<32x16xbf16>
    %c0_2 = arith.constant 0 : index
    %c0_3 = arith.constant 0 : index
    %2 = vector.load %arg2[%c0_2, %c0_3] : memref<32x16xbf16, #tpu.memory_space<vmem>>, vector<32x16xbf16>
    tpu.vector_store %arg2[%c0_2, %c0_3], %1 {strides = array<i32>} : memref<32x16xbf16, #tpu.memory_space<vmem>>, vector<32x16xbf16>,
    return
  }
  func.func @transform_0(%arg0: i32) -> (i32, i32, i32) {
    %c0_i32 = arith.constant 0 : i32
    %c0_i32_0 = arith.constant 0 : i32
    %c0_i32_1 = arith.constant 0 : i32
    return %c0_i32, %arg0, %c0_i32_0 : i32, i32, i32
  }
  func.func @transform_1(%arg0: i32) -> (i32, i32) {
    %c0_i32 = arith.constant 0 : i32
    %c0_i32_0 = arith.constant 0 : i32
    return %arg0, %c0_i32 : i32, i32
  }
}

module attributes {stable_mosaic.version = 11 : i64} {
  func.func @_mm_kernel(%arg0: i32, %arg1: i32, %arg2: i32, %arg3: memref<32x128xbf16, #tpu.memory_space<vmem>>, %arg4: memref<128x128xbf16, #tpu.memory_space<vmem>>, %arg5: memref<1x128xf32, #tpu.memory_space<vmem>>, %arg6: memref<1x128xf32, #tpu.memory_space<vmem>>, %arg7: memref<1x128xf32, #tpu.memory_space<vmem>>, %arg8: memref<1x128xf32, #tpu.memory_space<vmem>>, %arg9: memref<32x128xbf16, #tpu.memory_space<vmem>>, %arg10: memref<32x128xf32, #tpu.memory_space<vmem>>) attributes {dimension_semantics = [#tpu.dimension_semantics<parallel>, #tpu.dimension_semantics<parallel>, #tpu.dimension_semantics<arbitrary>], iteration_bounds = array<i64: 1, 1, 1>, scalar_prefetch = 0 : i64, scratch_operands = 1 : i64, tpu.core_type = #tpu.core_type<tc>, window_params = [{transform_indices = @transform_0, window_bounds = array<i64: 32, 128>}, {transform_indices = @transform_1, window_bounds = array<i64: 128, 128>}, {transform_indices = @transform_2, window_bounds = array<i64: 1, 128>}, {transform_indices = @transform_3, window_bounds = array<i64: 1, 128>}, {transform_indices = @transform_4, window_bounds = array<i64: 1, 128>}, {transform_indices = @transform_5, window_bounds = array<i64: 1, 128>}, {transform_indices = @transform_6, window_bounds = array<i64: 32, 128>}]} {
    %c0_i32 = arith.constant 0 : i32
    %0 = arith.cmpi eq, %arg2, %c0_i32 : i32
    %1 = arith.extui %0 : i1 to i32
    %c0_i32_0 = arith.constant 0 : i32
    %2 = arith.cmpi ne, %1, %c0_i32_0 : i32
    scf.if %2 {
      %cst_15 = arith.constant 0.000000e+00 : f32
      %22 = vector.broadcast %cst_15 : f32 to vector<32x128xf32>
      %c0_16 = arith.constant 0 : index
      %c0_17 = arith.constant 0 : index
      %23 = vector.load %arg10[%c0_16, %c0_17] : memref<32x128xf32, #tpu.memory_space<vmem>>, vector<32x128xf32>
      tpu.vector_store %arg10[%c0_16, %c0_17], %22 {strides = array<i32>} : memref<32x128xf32, #tpu.memory_space<vmem>>, vector<32x128xf32>,
    } else {
    }
    %c0 = arith.constant 0 : index
    %c0_1 = arith.constant 0 : index
    %3 = vector.load %arg3[%c0, %c0_1] : memref<32x128xbf16, #tpu.memory_space<vmem>>, vector<32x128xbf16>
    %4 = arith.extf %3 : vector<32x128xbf16> to vector<32x128xf32>
    %c0_2 = arith.constant 0 : index
    %c0_3 = arith.constant 0 : index
    %5 = vector.load %arg5[%c0_2, %c0_3] : memref<1x128xf32, #tpu.memory_space<vmem>>, vector<1x128xf32>
    %6 = vector.broadcast %5 : vector<1x128xf32> to vector<32x128xf32>
    %7 = arith.mulf %4, %6 : vector<32x128xf32>
    %c0_4 = arith.constant 0 : index
    %c0_5 = arith.constant 0 : index
    %8 = vector.load %arg6[%c0_4, %c0_5] : memref<1x128xf32, #tpu.memory_space<vmem>>, vector<1x128xf32>
    %9 = vector.broadcast %8 : vector<1x128xf32> to vector<32x128xf32>
    %10 = arith.addf %7, %9 : vector<32x128xf32>
    %cst = arith.constant 0.000000e+00 : f32
    %11 = vector.broadcast %cst : f32 to vector<32x128xf32>
    %12 = arith.maximumf %10, %11 : vector<32x128xf32>
    %13 = arith.truncf %12 : vector<32x128xf32> to vector<32x128xbf16>
    %c0_6 = arith.constant 0 : index
    %c0_7 = arith.constant 0 : index
    %14 = vector.load %arg4[%c0_6, %c0_7] : memref<128x128xbf16, #tpu.memory_space<vmem>>, vector<128x128xbf16>
    %c0_8 = arith.constant 0 : index
    %c0_9 = arith.constant 0 : index
    %15 = vector.load %arg10[%c0_8, %c0_9] : memref<32x128xf32, #tpu.memory_space<vmem>>, vector<32x128xf32>
    %cst_10 = arith.constant dense<0.000000e+00> : vector<32x128xf32>
    %16 = tpu.matmul %13, %14, %cst_10 {dimension_numbers = #tpu.dot_dimension_numbers<[1], [0], [0], [1], [0, 0, 1, 1], [], []>} : vector<32x128xbf16>, vector<128x128xbf16>, vector<32x128xf32> -> vector<32x128xf32>
    %17 = arith.addf %15, %16 : vector<32x128xf32>
    %c0_11 = arith.constant 0 : index
    %c0_12 = arith.constant 0 : index
    %18 = vector.load %arg10[%c0_11, %c0_12] : memref<32x128xf32, #tpu.memory_space<vmem>>, vector<32x128xf32>
    tpu.vector_store %arg10[%c0_11, %c0_12], %17 {strides = array<i32>} : memref<32x128xf32, #tpu.memory_space<vmem>>, vector<32x128xf32>,
    %c0_i32_13 = arith.constant 0 : i32
    %19 = arith.cmpi eq, %arg2, %c0_i32_13 : i32
    %20 = arith.extui %19 : i1 to i32
    %c0_i32_14 = arith.constant 0 : i32
    %21 = arith.cmpi ne, %20, %c0_i32_14 : i32
    scf.if %21 {
      %c0_15 = arith.constant 0 : index
      %c0_16 = arith.constant 0 : index
      %22 = vector.load %arg10[%c0_15, %c0_16] : memref<32x128xf32, #tpu.memory_space<vmem>>, vector<32x128xf32>
      %c0_17 = arith.constant 0 : index
      %c0_18 = arith.constant 0 : index
      %23 = vector.load %arg7[%c0_17, %c0_18] : memref<1x128xf32, #tpu.memory_space<vmem>>, vector<1x128xf32>
      %24 = vector.broadcast %23 : vector<1x128xf32> to vector<32x128xf32>
      %25 = arith.mulf %22, %24 : vector<32x128xf32>
      %c0_19 = arith.constant 0 : index
      %c0_20 = arith.constant 0 : index
      %26 = vector.load %arg8[%c0_19, %c0_20] : memref<1x128xf32, #tpu.memory_space<vmem>>, vector<1x128xf32>
      %27 = vector.broadcast %26 : vector<1x128xf32> to vector<32x128xf32>
      %28 = arith.addf %25, %27 : vector<32x128xf32>
      %cst_21 = arith.constant 0.000000e+00 : f32
      %29 = vector.broadcast %cst_21 : f32 to vector<32x128xf32>
      %30 = arith.maximumf %28, %29 : vector<32x128xf32>
      %31 = arith.truncf %30 : vector<32x128xf32> to vector<32x128xbf16>
      %c0_22 = arith.constant 0 : index
      %c0_23 = arith.constant 0 : index
      %32 = vector.load %arg9[%c0_22, %c0_23] : memref<32x128xbf16, #tpu.memory_space<vmem>>, vector<32x128xbf16>
      tpu.vector_store %arg9[%c0_22, %c0_23], %31 {strides = array<i32>} : memref<32x128xbf16, #tpu.memory_space<vmem>>, vector<32x128xbf16>,
    } else {
    }
    return
  }
  func.func @transform_0(%arg0: i32, %arg1: i32, %arg2: i32) -> (i32, i32) {
    %c0_i32 = arith.constant 0 : i32
    return %arg0, %arg2 : i32, i32
  }
  func.func @transform_1(%arg0: i32, %arg1: i32, %arg2: i32) -> (i32, i32) {
    %c0_i32 = arith.constant 0 : i32
    return %arg2, %arg1 : i32, i32
  }
  func.func @transform_2(%arg0: i32, %arg1: i32, %arg2: i32) -> (i32, i32) {
    %c0_i32 = arith.constant 0 : i32
    %c0_i32_0 = arith.constant 0 : i32
    return %c0_i32, %arg2 : i32, i32
  }
  func.func @transform_3(%arg0: i32, %arg1: i32, %arg2: i32) -> (i32, i32) {
    %c0_i32 = arith.constant 0 : i32
    %c0_i32_0 = arith.constant 0 : i32
    return %c0_i32, %arg2 : i32, i32
  }
  func.func @transform_4(%arg0: i32, %arg1: i32, %arg2: i32) -> (i32, i32) {
    %c0_i32 = arith.constant 0 : i32
    %c0_i32_0 = arith.constant 0 : i32
    return %c0_i32, %arg1 : i32, i32
  }
  func.func @transform_5(%arg0: i32, %arg1: i32, %arg2: i32) -> (i32, i32) {
    %c0_i32 = arith.constant 0 : i32
    %c0_i32_0 = arith.constant 0 : i32
    return %c0_i32, %arg1 : i32, i32
  }
  func.func @transform_6(%arg0: i32, %arg1: i32, %arg2: i32) -> (i32, i32) {
    %c0_i32 = arith.constant 0 : i32
    return %arg0, %arg1 : i32, i32
  }
}

module attributes {stable_mosaic.version = 11 : i64} {
  func.func @_mm_kernel(%arg0: i32, %arg1: i32, %arg2: i32, %arg3: memref<32x128xbf16, #tpu.memory_space<vmem>>, %arg4: memref<128x128xbf16, #tpu.memory_space<vmem>>, %arg5: memref<32x128xbf16, #tpu.memory_space<vmem>>, %arg6: memref<32x128xf32, #tpu.memory_space<vmem>>) attributes {dimension_semantics = [#tpu.dimension_semantics<parallel>, #tpu.dimension_semantics<parallel>, #tpu.dimension_semantics<arbitrary>], iteration_bounds = array<i64: 1, 1, 3>, scalar_prefetch = 0 : i64, scratch_operands = 1 : i64, tpu.core_type = #tpu.core_type<tc>, window_params = [{transform_indices = @transform_0, window_bounds = array<i64: 32, 128>}, {transform_indices = @transform_1, window_bounds = array<i64: 128, 128>}, {transform_indices = @transform_2, window_bounds = array<i64: 32, 128>}]} {
    %c0_i32 = arith.constant 0 : i32
    %0 = arith.cmpi eq, %arg2, %c0_i32 : i32
    %1 = arith.extui %0 : i1 to i32
    %c0_i32_0 = arith.constant 0 : i32
    %2 = arith.cmpi ne, %1, %c0_i32_0 : i32
    scf.if %2 {
      %cst_9 = arith.constant 0.000000e+00 : f32
      %12 = vector.broadcast %cst_9 : f32 to vector<32x128xf32>
      %c0_10 = arith.constant 0 : index
      %c0_11 = arith.constant 0 : index
      %13 = vector.load %arg6[%c0_10, %c0_11] : memref<32x128xf32, #tpu.memory_space<vmem>>, vector<32x128xf32>
      tpu.vector_store %arg6[%c0_10, %c0_11], %12 {strides = array<i32>} : memref<32x128xf32, #tpu.memory_space<vmem>>, vector<32x128xf32>,
    } else {
    }
    %c0 = arith.constant 0 : index
    %c0_1 = arith.constant 0 : index
    %3 = vector.load %arg3[%c0, %c0_1] : memref<32x128xbf16, #tpu.memory_space<vmem>>, vector<32x128xbf16>
    %c0_2 = arith.constant 0 : index
    %c0_3 = arith.constant 0 : index
    %4 = vector.load %arg4[%c0_2, %c0_3] : memref<128x128xbf16, #tpu.memory_space<vmem>>, vector<128x128xbf16>
    %c0_4 = arith.constant 0 : index
    %c0_5 = arith.constant 0 : index
    %5 = vector.load %arg6[%c0_4, %c0_5] : memref<32x128xf32, #tpu.memory_space<vmem>>, vector<32x128xf32>
    %cst = arith.constant dense<0.000000e+00> : vector<32x128xf32>
    %6 = tpu.matmul %3, %4, %cst {dimension_numbers = #tpu.dot_dimension_numbers<[1], [0], [0], [1], [0, 0, 1, 1], [], []>} : vector<32x128xbf16>, vector<128x128xbf16>, vector<32x128xf32> -> vector<32x128xf32>
    %7 = arith.addf %5, %6 : vector<32x128xf32>
    %c0_6 = arith.constant 0 : index
    %c0_7 = arith.constant 0 : index
    %8 = vector.load %arg6[%c0_6, %c0_7] : memref<32x128xf32, #tpu.memory_space<vmem>>, vector<32x128xf32>
    tpu.vector_store %arg6[%c0_6, %c0_7], %7 {strides = array<i32>} : memref<32x128xf32, #tpu.memory_space<vmem>>, vector<32x128xf32>,
    %c2_i32 = arith.constant 2 : i32
    %9 = arith.cmpi eq, %arg2, %c2_i32 : i32
    %10 = arith.extui %9 : i1 to i32
    %c0_i32_8 = arith.constant 0 : i32
    %11 = arith.cmpi ne, %10, %c0_i32_8 : i32
    scf.if %11 {
      %c0_9 = arith.constant 0 : index
      %c0_10 = arith.constant 0 : index
      %12 = vector.load %arg6[%c0_9, %c0_10] : memref<32x128xf32, #tpu.memory_space<vmem>>, vector<32x128xf32>
      %13 = arith.truncf %12 : vector<32x128xf32> to vector<32x128xbf16>
      %c0_11 = arith.constant 0 : index
      %c0_12 = arith.constant 0 : index
      %14 = vector.load %arg5[%c0_11, %c0_12] : memref<32x128xbf16, #tpu.memory_space<vmem>>, vector<32x128xbf16>
      tpu.vector_store %arg5[%c0_11, %c0_12], %13 {strides = array<i32>} : memref<32x128xbf16, #tpu.memory_space<vmem>>, vector<32x128xbf16>,
    } else {
    }
    return
  }
  func.func @transform_0(%arg0: i32, %arg1: i32, %arg2: i32) -> (i32, i32) {
    %c0_i32 = arith.constant 0 : i32
    return %arg0, %arg2 : i32, i32
  }
  func.func @transform_1(%arg0: i32, %arg1: i32, %arg2: i32) -> (i32, i32) {
    %c0_i32 = arith.constant 0 : i32
    return %arg2, %arg1 : i32, i32
  }
  func.func @transform_2(%arg0: i32, %arg1: i32, %arg2: i32) -> (i32, i32) {
    %c0_i32 = arith.constant 0 : i32
    return %arg0, %arg1 : i32, i32
  }
}

module attributes {stable_mosaic.version = 11 : i64} {
  func.func @_mm_kernel(%arg0: i32, %arg1: i32, %arg2: i32, %arg3: memref<32x128xbf16, #tpu.memory_space<vmem>>, %arg4: memref<128x128xbf16, #tpu.memory_space<vmem>>, %arg5: memref<1x128xf32, #tpu.memory_space<vmem>>, %arg6: memref<1x128xf32, #tpu.memory_space<vmem>>, %arg7: memref<32x128xbf16, #tpu.memory_space<vmem>>, %arg8: memref<32x128xf32, #tpu.memory_space<vmem>>) attributes {dimension_semantics = [#tpu.dimension_semantics<parallel>, #tpu.dimension_semantics<parallel>, #tpu.dimension_semantics<arbitrary>], iteration_bounds = array<i64: 1, 1, 1>, scalar_prefetch = 0 : i64, scratch_operands = 1 : i64, tpu.core_type = #tpu.core_type<tc>, window_params = [{transform_indices = @transform_0, window_bounds = array<i64: 32, 128>}, {transform_indices = @transform_1, window_bounds = array<i64: 128, 128>}, {transform_indices = @transform_2, window_bounds = array<i64: 1, 128>}, {transform_indices = @transform_3, window_bounds = array<i64: 1, 128>}, {transform_indices = @transform_4, window_bounds = array<i64: 32, 128>}]} {
    %c0_i32 = arith.constant 0 : i32
    %0 = arith.cmpi eq, %arg2, %c0_i32 : i32
    %1 = arith.extui %0 : i1 to i32
    %c0_i32_0 = arith.constant 0 : i32
    %2 = arith.cmpi ne, %1, %c0_i32_0 : i32
    scf.if %2 {
      %cst_15 = arith.constant 0.000000e+00 : f32
      %22 = vector.broadcast %cst_15 : f32 to vector<32x128xf32>
      %c0_16 = arith.constant 0 : index
      %c0_17 = arith.constant 0 : index
      %23 = vector.load %arg8[%c0_16, %c0_17] : memref<32x128xf32, #tpu.memory_space<vmem>>, vector<32x128xf32>
      tpu.vector_store %arg8[%c0_16, %c0_17], %22 {strides = array<i32>} : memref<32x128xf32, #tpu.memory_space<vmem>>, vector<32x128xf32>,
    } else {
    }
    %c0 = arith.constant 0 : index
    %c0_1 = arith.constant 0 : index
    %3 = vector.load %arg3[%c0, %c0_1] : memref<32x128xbf16, #tpu.memory_space<vmem>>, vector<32x128xbf16>
    %4 = arith.extf %3 : vector<32x128xbf16> to vector<32x128xf32>
    %c0_2 = arith.constant 0 : index
    %c0_3 = arith.constant 0 : index
    %5 = vector.load %arg5[%c0_2, %c0_3] : memref<1x128xf32, #tpu.memory_space<vmem>>, vector<1x128xf32>
    %6 = vector.broadcast %5 : vector<1x128xf32> to vector<32x128xf32>
    %7 = arith.mulf %4, %6 : vector<32x128xf32>
    %c0_4 = arith.constant 0 : index
    %c0_5 = arith.constant 0 : index
    %8 = vector.load %arg6[%c0_4, %c0_5] : memref<1x128xf32, #tpu.memory_space<vmem>>, vector<1x128xf32>
    %9 = vector.broadcast %8 : vector<1x128xf32> to vector<32x128xf32>
    %10 = arith.addf %7, %9 : vector<32x128xf32>
    %cst = arith.constant 0.000000e+00 : f32
    %11 = vector.broadcast %cst : f32 to vector<32x128xf32>
    %12 = arith.maximumf %10, %11 : vector<32x128xf32>
    %13 = arith.truncf %12 : vector<32x128xf32> to vector<32x128xbf16>
    %c0_6 = arith.constant 0 : index
    %c0_7 = arith.constant 0 : index
    %14 = vector.load %arg4[%c0_6, %c0_7] : memref<128x128xbf16, #tpu.memory_space<vmem>>, vector<128x128xbf16>
    %c0_8 = arith.constant 0 : index
    %c0_9 = arith.constant 0 : index
    %15 = vector.load %arg8[%c0_8, %c0_9] : memref<32x128xf32, #tpu.memory_space<vmem>>, vector<32x128xf32>
    %cst_10 = arith.constant dense<0.000000e+00> : vector<32x128xf32>
    %16 = tpu.matmul %13, %14, %cst_10 {dimension_numbers = #tpu.dot_dimension_numbers<[1], [0], [0], [1], [0, 0, 1, 1], [], []>} : vector<32x128xbf16>, vector<128x128xbf16>, vector<32x128xf32> -> vector<32x128xf32>
    %17 = arith.addf %15, %16 : vector<32x128xf32>
    %c0_11 = arith.constant 0 : index
    %c0_12 = arith.constant 0 : index
    %18 = vector.load %arg8[%c0_11, %c0_12] : memref<32x128xf32, #tpu.memory_space<vmem>>, vector<32x128xf32>
    tpu.vector_store %arg8[%c0_11, %c0_12], %17 {strides = array<i32>} : memref<32x128xf32, #tpu.memory_space<vmem>>, vector<32x128xf32>,
    %c0_i32_13 = arith.constant 0 : i32
    %19 = arith.cmpi eq, %arg2, %c0_i32_13 : i32
    %20 = arith.extui %19 : i1 to i32
    %c0_i32_14 = arith.constant 0 : i32
    %21 = arith.cmpi ne, %20, %c0_i32_14 : i32
    scf.if %21 {
      %c0_15 = arith.constant 0 : index
      %c0_16 = arith.constant 0 : index
      %22 = vector.load %arg8[%c0_15, %c0_16] : memref<32x128xf32, #tpu.memory_space<vmem>>, vector<32x128xf32>
      %23 = arith.truncf %22 : vector<32x128xf32> to vector<32x128xbf16>
      %c0_17 = arith.constant 0 : index
      %c0_18 = arith.constant 0 : index
      %24 = vector.load %arg7[%c0_17, %c0_18] : memref<32x128xbf16, #tpu.memory_space<vmem>>, vector<32x128xbf16>
      tpu.vector_store %arg7[%c0_17, %c0_18], %23 {strides = array<i32>} : memref<32x128xbf16, #tpu.memory_space<vmem>>, vector<32x128xbf16>,
    } else {
    }
    return
  }
  func.func @transform_0(%arg0: i32, %arg1: i32, %arg2: i32) -> (i32, i32) {
    %c0_i32 = arith.constant 0 : i32
    return %arg0, %arg2 : i32, i32
  }
  func.func @transform_1(%arg0: i32, %arg1: i32, %arg2: i32) -> (i32, i32) {
    %c0_i32 = arith.constant 0 : i32
    return %arg2, %arg1 : i32, i32
  }
  func.func @transform_2(%arg0: i32, %arg1: i32, %arg2: i32) -> (i32, i32) {
    %c0_i32 = arith.constant 0 : i32
    %c0_i32_0 = arith.constant 0 : i32
    return %c0_i32, %arg2 : i32, i32
  }
  func.func @transform_3(%arg0: i32, %arg1: i32, %arg2: i32) -> (i32, i32) {
    %c0_i32 = arith.constant 0 : i32
    %c0_i32_0 = arith.constant 0 : i32
    return %c0_i32, %arg2 : i32, i32
  }
  func.func @transform_4(%arg0: i32, %arg1: i32, %arg2: i32) -> (i32, i32) {
    %c0_i32 = arith.constant 0 : i32
    return %arg0, %arg1 : i32, i32
  }
}

module attributes {stable_mosaic.version = 11 : i64} {
  func.func @_pool_mean_kernel(%arg0: i32, %arg1: memref<4x8x16xbf16, #tpu.memory_space<vmem>>, %arg2: memref<8x16xbf16, #tpu.memory_space<vmem>>) attributes {dimension_semantics = [#tpu.dimension_semantics<parallel>], iteration_bounds = array<i64: 1>, scalar_prefetch = 0 : i64, scratch_operands = 0 : i64, tpu.core_type = #tpu.core_type<tc>, window_params = [{transform_indices = @transform_0, window_bounds = array<i64: 4, 8, 16>}, {transform_indices = @transform_1, window_bounds = array<i64: 8, 16>}]} {
    %c0 = arith.constant 0 : index
    %c0_0 = arith.constant 0 : index
    %c0_1 = arith.constant 0 : index
    %0 = vector.load %arg1[%c0, %c0_0, %c0_1] : memref<4x8x16xbf16, #tpu.memory_space<vmem>>, vector<4x8x16xbf16>
    %1 = arith.extf %0 : vector<4x8x16xbf16> to vector<4x8x16xf32>
    %cst = arith.constant dense<0.000000e+00> : vector<8x16xf32>
    %2 = vector.multi_reduction <add>, %1, %cst [0] : vector<4x8x16xf32> to vector<8x16xf32>
    %cst_2 = arith.constant 4.000000e+00 : f32
    %3 = vector.broadcast %cst_2 : f32 to vector<8x16xf32>
    %4 = arith.divf %2, %3 : vector<8x16xf32>
    %5 = arith.truncf %4 : vector<8x16xf32> to vector<8x16xbf16>
    %c0_3 = arith.constant 0 : index
    %c0_4 = arith.constant 0 : index
    %6 = vector.load %arg2[%c0_3, %c0_4] : memref<8x16xbf16, #tpu.memory_space<vmem>>, vector<8x16xbf16>
    tpu.vector_store %arg2[%c0_3, %c0_4], %5 {strides = array<i32>} : memref<8x16xbf16, #tpu.memory_space<vmem>>, vector<8x16xbf16>,
    return
  }
  func.func @transform_0(%arg0: i32) -> (i32, i32, i32) {
    %c0_i32 = arith.constant 0 : i32
    %c0_i32_0 = arith.constant 0 : i32
    %c0_i32_1 = arith.constant 0 : i32
    return %c0_i32, %arg0, %c0_i32_0 : i32, i32, i32
  }
  func.func @transform_1(%arg0: i32) -> (i32, i32) {
    %c0_i32 = arith.constant 0 : i32
    %c0_i32_0 = arith.constant 0 : i32
    return %arg0, %c0_i32 : i32, i32
  }
}

module attributes {stable_mosaic.version = 11 : i64} {
  func.func @_mm_kernel(%arg0: i32, %arg1: i32, %arg2: i32, %arg3: memref<8x128xbf16, #tpu.memory_space<vmem>>, %arg4: memref<128x128xbf16, #tpu.memory_space<vmem>>, %arg5: memref<1x128xf32, #tpu.memory_space<vmem>>, %arg6: memref<1x128xf32, #tpu.memory_space<vmem>>, %arg7: memref<1x128xf32, #tpu.memory_space<vmem>>, %arg8: memref<1x128xf32, #tpu.memory_space<vmem>>, %arg9: memref<8x128xbf16, #tpu.memory_space<vmem>>, %arg10: memref<8x128xf32, #tpu.memory_space<vmem>>) attributes {dimension_semantics = [#tpu.dimension_semantics<parallel>, #tpu.dimension_semantics<parallel>, #tpu.dimension_semantics<arbitrary>], iteration_bounds = array<i64: 1, 1, 1>, scalar_prefetch = 0 : i64, scratch_operands = 1 : i64, tpu.core_type = #tpu.core_type<tc>, window_params = [{transform_indices = @transform_0, window_bounds = array<i64: 8, 128>}, {transform_indices = @transform_1, window_bounds = array<i64: 128, 128>}, {transform_indices = @transform_2, window_bounds = array<i64: 1, 128>}, {transform_indices = @transform_3, window_bounds = array<i64: 1, 128>}, {transform_indices = @transform_4, window_bounds = array<i64: 1, 128>}, {transform_indices = @transform_5, window_bounds = array<i64: 1, 128>}, {transform_indices = @transform_6, window_bounds = array<i64: 8, 128>}]} {
    %c0_i32 = arith.constant 0 : i32
    %0 = arith.cmpi eq, %arg2, %c0_i32 : i32
    %1 = arith.extui %0 : i1 to i32
    %c0_i32_0 = arith.constant 0 : i32
    %2 = arith.cmpi ne, %1, %c0_i32_0 : i32
    scf.if %2 {
      %cst_15 = arith.constant 0.000000e+00 : f32
      %22 = vector.broadcast %cst_15 : f32 to vector<8x128xf32>
      %c0_16 = arith.constant 0 : index
      %c0_17 = arith.constant 0 : index
      %23 = vector.load %arg10[%c0_16, %c0_17] : memref<8x128xf32, #tpu.memory_space<vmem>>, vector<8x128xf32>
      tpu.vector_store %arg10[%c0_16, %c0_17], %22 {strides = array<i32>} : memref<8x128xf32, #tpu.memory_space<vmem>>, vector<8x128xf32>,
    } else {
    }
    %c0 = arith.constant 0 : index
    %c0_1 = arith.constant 0 : index
    %3 = vector.load %arg3[%c0, %c0_1] : memref<8x128xbf16, #tpu.memory_space<vmem>>, vector<8x128xbf16>
    %4 = arith.extf %3 : vector<8x128xbf16> to vector<8x128xf32>
    %c0_2 = arith.constant 0 : index
    %c0_3 = arith.constant 0 : index
    %5 = vector.load %arg5[%c0_2, %c0_3] : memref<1x128xf32, #tpu.memory_space<vmem>>, vector<1x128xf32>
    %6 = vector.broadcast %5 : vector<1x128xf32> to vector<8x128xf32>
    %7 = arith.mulf %4, %6 : vector<8x128xf32>
    %c0_4 = arith.constant 0 : index
    %c0_5 = arith.constant 0 : index
    %8 = vector.load %arg6[%c0_4, %c0_5] : memref<1x128xf32, #tpu.memory_space<vmem>>, vector<1x128xf32>
    %9 = vector.broadcast %8 : vector<1x128xf32> to vector<8x128xf32>
    %10 = arith.addf %7, %9 : vector<8x128xf32>
    %cst = arith.constant 0.000000e+00 : f32
    %11 = vector.broadcast %cst : f32 to vector<8x128xf32>
    %12 = arith.maximumf %10, %11 : vector<8x128xf32>
    %13 = arith.truncf %12 : vector<8x128xf32> to vector<8x128xbf16>
    %c0_6 = arith.constant 0 : index
    %c0_7 = arith.constant 0 : index
    %14 = vector.load %arg4[%c0_6, %c0_7] : memref<128x128xbf16, #tpu.memory_space<vmem>>, vector<128x128xbf16>
    %c0_8 = arith.constant 0 : index
    %c0_9 = arith.constant 0 : index
    %15 = vector.load %arg10[%c0_8, %c0_9] : memref<8x128xf32, #tpu.memory_space<vmem>>, vector<8x128xf32>
    %cst_10 = arith.constant dense<0.000000e+00> : vector<8x128xf32>
    %16 = tpu.matmul %13, %14, %cst_10 {dimension_numbers = #tpu.dot_dimension_numbers<[1], [0], [0], [1], [0, 0, 1, 1], [], []>} : vector<8x128xbf16>, vector<128x128xbf16>, vector<8x128xf32> -> vector<8x128xf32>
    %17 = arith.addf %15, %16 : vector<8x128xf32>
    %c0_11 = arith.constant 0 : index
    %c0_12 = arith.constant 0 : index
    %18 = vector.load %arg10[%c0_11, %c0_12] : memref<8x128xf32, #tpu.memory_space<vmem>>, vector<8x128xf32>
    tpu.vector_store %arg10[%c0_11, %c0_12], %17 {strides = array<i32>} : memref<8x128xf32, #tpu.memory_space<vmem>>, vector<8x128xf32>,
    %c0_i32_13 = arith.constant 0 : i32
    %19 = arith.cmpi eq, %arg2, %c0_i32_13 : i32
    %20 = arith.extui %19 : i1 to i32
    %c0_i32_14 = arith.constant 0 : i32
    %21 = arith.cmpi ne, %20, %c0_i32_14 : i32
    scf.if %21 {
      %c0_15 = arith.constant 0 : index
      %c0_16 = arith.constant 0 : index
      %22 = vector.load %arg10[%c0_15, %c0_16] : memref<8x128xf32, #tpu.memory_space<vmem>>, vector<8x128xf32>
      %c0_17 = arith.constant 0 : index
      %c0_18 = arith.constant 0 : index
      %23 = vector.load %arg7[%c0_17, %c0_18] : memref<1x128xf32, #tpu.memory_space<vmem>>, vector<1x128xf32>
      %24 = vector.broadcast %23 : vector<1x128xf32> to vector<8x128xf32>
      %25 = arith.mulf %22, %24 : vector<8x128xf32>
      %c0_19 = arith.constant 0 : index
      %c0_20 = arith.constant 0 : index
      %26 = vector.load %arg8[%c0_19, %c0_20] : memref<1x128xf32, #tpu.memory_space<vmem>>, vector<1x128xf32>
      %27 = vector.broadcast %26 : vector<1x128xf32> to vector<8x128xf32>
      %28 = arith.addf %25, %27 : vector<8x128xf32>
      %cst_21 = arith.constant 0.000000e+00 : f32
      %29 = vector.broadcast %cst_21 : f32 to vector<8x128xf32>
      %30 = arith.maximumf %28, %29 : vector<8x128xf32>
      %31 = arith.truncf %30 : vector<8x128xf32> to vector<8x128xbf16>
      %c0_22 = arith.constant 0 : index
      %c0_23 = arith.constant 0 : index
      %32 = vector.load %arg9[%c0_22, %c0_23] : memref<8x128xbf16, #tpu.memory_space<vmem>>, vector<8x128xbf16>
      tpu.vector_store %arg9[%c0_22, %c0_23], %31 {strides = array<i32>} : memref<8x128xbf16, #tpu.memory_space<vmem>>, vector<8x128xbf16>,
    } else {
    }
    return
  }
  func.func @transform_0(%arg0: i32, %arg1: i32, %arg2: i32) -> (i32, i32) {
    %c0_i32 = arith.constant 0 : i32
    return %arg0, %arg2 : i32, i32
  }
  func.func @transform_1(%arg0: i32, %arg1: i32, %arg2: i32) -> (i32, i32) {
    %c0_i32 = arith.constant 0 : i32
    return %arg2, %arg1 : i32, i32
  }
  func.func @transform_2(%arg0: i32, %arg1: i32, %arg2: i32) -> (i32, i32) {
    %c0_i32 = arith.constant 0 : i32
    %c0_i32_0 = arith.constant 0 : i32
    return %c0_i32, %arg2 : i32, i32
  }
  func.func @transform_3(%arg0: i32, %arg1: i32, %arg2: i32) -> (i32, i32) {
    %c0_i32 = arith.constant 0 : i32
    %c0_i32_0 = arith.constant 0 : i32
    return %c0_i32, %arg2 : i32, i32
  }
  func.func @transform_4(%arg0: i32, %arg1: i32, %arg2: i32) -> (i32, i32) {
    %c0_i32 = arith.constant 0 : i32
    %c0_i32_0 = arith.constant 0 : i32
    return %c0_i32, %arg1 : i32, i32
  }
  func.func @transform_5(%arg0: i32, %arg1: i32, %arg2: i32) -> (i32, i32) {
    %c0_i32 = arith.constant 0 : i32
    %c0_i32_0 = arith.constant 0 : i32
    return %c0_i32, %arg1 : i32, i32
  }
  func.func @transform_6(%arg0: i32, %arg1: i32, %arg2: i32) -> (i32, i32) {
    %c0_i32 = arith.constant 0 : i32
    return %arg0, %arg1 : i32, i32
  }
}

module attributes {stable_mosaic.version = 11 : i64} {
  func.func @_mm_kernel(%arg0: i32, %arg1: i32, %arg2: i32, %arg3: memref<8x128xbf16, #tpu.memory_space<vmem>>, %arg4: memref<128x128xbf16, #tpu.memory_space<vmem>>, %arg5: memref<8x128xbf16, #tpu.memory_space<vmem>>, %arg6: memref<8x128xf32, #tpu.memory_space<vmem>>) attributes {dimension_semantics = [#tpu.dimension_semantics<parallel>, #tpu.dimension_semantics<parallel>, #tpu.dimension_semantics<arbitrary>], iteration_bounds = array<i64: 1, 1, 3>, scalar_prefetch = 0 : i64, scratch_operands = 1 : i64, tpu.core_type = #tpu.core_type<tc>, window_params = [{transform_indices = @transform_0, window_bounds = array<i64: 8, 128>}, {transform_indices = @transform_1, window_bounds = array<i64: 128, 128>}, {transform_indices = @transform_2, window_bounds = array<i64: 8, 128>}]} {
    %c0_i32 = arith.constant 0 : i32
    %0 = arith.cmpi eq, %arg2, %c0_i32 : i32
    %1 = arith.extui %0 : i1 to i32
    %c0_i32_0 = arith.constant 0 : i32
    %2 = arith.cmpi ne, %1, %c0_i32_0 : i32
    scf.if %2 {
      %cst_9 = arith.constant 0.000000e+00 : f32
      %12 = vector.broadcast %cst_9 : f32 to vector<8x128xf32>
      %c0_10 = arith.constant 0 : index
      %c0_11 = arith.constant 0 : index
      %13 = vector.load %arg6[%c0_10, %c0_11] : memref<8x128xf32, #tpu.memory_space<vmem>>, vector<8x128xf32>
      tpu.vector_store %arg6[%c0_10, %c0_11], %12 {strides = array<i32>} : memref<8x128xf32, #tpu.memory_space<vmem>>, vector<8x128xf32>,
    } else {
    }
    %c0 = arith.constant 0 : index
    %c0_1 = arith.constant 0 : index
    %3 = vector.load %arg3[%c0, %c0_1] : memref<8x128xbf16, #tpu.memory_space<vmem>>, vector<8x128xbf16>
    %c0_2 = arith.constant 0 : index
    %c0_3 = arith.constant 0 : index
    %4 = vector.load %arg4[%c0_2, %c0_3] : memref<128x128xbf16, #tpu.memory_space<vmem>>, vector<128x128xbf16>
    %c0_4 = arith.constant 0 : index
    %c0_5 = arith.constant 0 : index
    %5 = vector.load %arg6[%c0_4, %c0_5] : memref<8x128xf32, #tpu.memory_space<vmem>>, vector<8x128xf32>
    %cst = arith.constant dense<0.000000e+00> : vector<8x128xf32>
    %6 = tpu.matmul %3, %4, %cst {dimension_numbers = #tpu.dot_dimension_numbers<[1], [0], [0], [1], [0, 0, 1, 1], [], []>} : vector<8x128xbf16>, vector<128x128xbf16>, vector<8x128xf32> -> vector<8x128xf32>
    %7 = arith.addf %5, %6 : vector<8x128xf32>
    %c0_6 = arith.constant 0 : index
    %c0_7 = arith.constant 0 : index
    %8 = vector.load %arg6[%c0_6, %c0_7] : memref<8x128xf32, #tpu.memory_space<vmem>>, vector<8x128xf32>
    tpu.vector_store %arg6[%c0_6, %c0_7], %7 {strides = array<i32>} : memref<8x128xf32, #tpu.memory_space<vmem>>, vector<8x128xf32>,
    %c2_i32 = arith.constant 2 : i32
    %9 = arith.cmpi eq, %arg2, %c2_i32 : i32
    %10 = arith.extui %9 : i1 to i32
    %c0_i32_8 = arith.constant 0 : i32
    %11 = arith.cmpi ne, %10, %c0_i32_8 : i32
    scf.if %11 {
      %c0_9 = arith.constant 0 : index
      %c0_10 = arith.constant 0 : index
      %12 = vector.load %arg6[%c0_9, %c0_10] : memref<8x128xf32, #tpu.memory_space<vmem>>, vector<8x128xf32>
      %13 = arith.truncf %12 : vector<8x128xf32> to vector<8x128xbf16>
      %c0_11 = arith.constant 0 : index
      %c0_12 = arith.constant 0 : index
      %14 = vector.load %arg5[%c0_11, %c0_12] : memref<8x128xbf16, #tpu.memory_space<vmem>>, vector<8x128xbf16>
      tpu.vector_store %arg5[%c0_11, %c0_12], %13 {strides = array<i32>} : memref<8x128xbf16, #tpu.memory_space<vmem>>, vector<8x128xbf16>,
    } else {
    }
    return
  }
  func.func @transform_0(%arg0: i32, %arg1: i32, %arg2: i32) -> (i32, i32) {
    %c0_i32 = arith.constant 0 : i32
    return %arg0, %arg2 : i32, i32
  }
  func.func @transform_1(%arg0: i32, %arg1: i32, %arg2: i32) -> (i32, i32) {
    %c0_i32 = arith.constant 0 : i32
    return %arg2, %arg1 : i32, i32
  }
  func.func @transform_2(%arg0: i32, %arg1: i32, %arg2: i32) -> (i32, i32) {
    %c0_i32 = arith.constant 0 : i32
    return %arg0, %arg1 : i32, i32
  }
}

module attributes {stable_mosaic.version = 11 : i64} {
  func.func @_pool_mean_kernel(%arg0: i32, %arg1: memref<4x8x32xbf16, #tpu.memory_space<vmem>>, %arg2: memref<8x32xf32, #tpu.memory_space<vmem>>) attributes {dimension_semantics = [#tpu.dimension_semantics<parallel>], iteration_bounds = array<i64: 1>, scalar_prefetch = 0 : i64, scratch_operands = 0 : i64, tpu.core_type = #tpu.core_type<tc>, window_params = [{transform_indices = @transform_0, window_bounds = array<i64: 4, 8, 32>}, {transform_indices = @transform_1, window_bounds = array<i64: 8, 32>}]} {
    %c0 = arith.constant 0 : index
    %c0_0 = arith.constant 0 : index
    %c0_1 = arith.constant 0 : index
    %0 = vector.load %arg1[%c0, %c0_0, %c0_1] : memref<4x8x32xbf16, #tpu.memory_space<vmem>>, vector<4x8x32xbf16>
    %1 = arith.extf %0 : vector<4x8x32xbf16> to vector<4x8x32xf32>
    %cst = arith.constant dense<0.000000e+00> : vector<8x32xf32>
    %2 = vector.multi_reduction <add>, %1, %cst [0] : vector<4x8x32xf32> to vector<8x32xf32>
    %cst_2 = arith.constant 4.000000e+00 : f32
    %3 = vector.broadcast %cst_2 : f32 to vector<8x32xf32>
    %4 = arith.divf %2, %3 : vector<8x32xf32>
    %c0_3 = arith.constant 0 : index
    %c0_4 = arith.constant 0 : index
    %5 = vector.load %arg2[%c0_3, %c0_4] : memref<8x32xf32, #tpu.memory_space<vmem>>, vector<8x32xf32>
    tpu.vector_store %arg2[%c0_3, %c0_4], %4 {strides = array<i32>} : memref<8x32xf32, #tpu.memory_space<vmem>>, vector<8x32xf32>,
    return
  }
  func.func @transform_0(%arg0: i32) -> (i32, i32, i32) {
    %c0_i32 = arith.constant 0 : i32
    %c0_i32_0 = arith.constant 0 : i32
    %c0_i32_1 = arith.constant 0 : i32
    return %c0_i32, %arg0, %c0_i32_0 : i32, i32, i32
  }
  func.func @transform_1(%arg0: i32) -> (i32, i32) {
    %c0_i32 = arith.constant 0 : i32
    %c0_i32_0 = arith.constant 0 : i32
    return %arg0, %c0_i32 : i32, i32
  }
}

module attributes {stable_mosaic.version = 11 : i64} {
  func.func @_mm_kernel(%arg0: i32, %arg1: i32, %arg2: i32, %arg3: memref<8x128xf32, #tpu.memory_space<vmem>>, %arg4: memref<128x128xbf16, #tpu.memory_space<vmem>>, %arg5: memref<1x128xf32, #tpu.memory_space<vmem>>, %arg6: memref<1x128xf32, #tpu.memory_space<vmem>>, %arg7: memref<8x128xf32, #tpu.memory_space<vmem>>, %arg8: memref<8x128xf32, #tpu.memory_space<vmem>>) attributes {dimension_semantics = [#tpu.dimension_semantics<parallel>, #tpu.dimension_semantics<parallel>, #tpu.dimension_semantics<arbitrary>], iteration_bounds = array<i64: 1, 1, 1>, scalar_prefetch = 0 : i64, scratch_operands = 1 : i64, tpu.core_type = #tpu.core_type<tc>, window_params = [{transform_indices = @transform_0, window_bounds = array<i64: 8, 128>}, {transform_indices = @transform_1, window_bounds = array<i64: 128, 128>}, {transform_indices = @transform_2, window_bounds = array<i64: 1, 128>}, {transform_indices = @transform_3, window_bounds = array<i64: 1, 128>}, {transform_indices = @transform_4, window_bounds = array<i64: 8, 128>}]} {
    %c0_i32 = arith.constant 0 : i32
    %0 = arith.cmpi eq, %arg2, %c0_i32 : i32
    %1 = arith.extui %0 : i1 to i32
    %c0_i32_0 = arith.constant 0 : i32
    %2 = arith.cmpi ne, %1, %c0_i32_0 : i32
    scf.if %2 {
      %cst_10 = arith.constant 0.000000e+00 : f32
      %13 = vector.broadcast %cst_10 : f32 to vector<8x128xf32>
      %c0_11 = arith.constant 0 : index
      %c0_12 = arith.constant 0 : index
      %14 = vector.load %arg8[%c0_11, %c0_12] : memref<8x128xf32, #tpu.memory_space<vmem>>, vector<8x128xf32>
      tpu.vector_store %arg8[%c0_11, %c0_12], %13 {strides = array<i32>} : memref<8x128xf32, #tpu.memory_space<vmem>>, vector<8x128xf32>,
    } else {
    }
    %c0 = arith.constant 0 : index
    %c0_1 = arith.constant 0 : index
    %3 = vector.load %arg3[%c0, %c0_1] : memref<8x128xf32, #tpu.memory_space<vmem>>, vector<8x128xf32>
    %4 = arith.truncf %3 : vector<8x128xf32> to vector<8x128xbf16>
    %c0_2 = arith.constant 0 : index
    %c0_3 = arith.constant 0 : index
    %5 = vector.load %arg4[%c0_2, %c0_3] : memref<128x128xbf16, #tpu.memory_space<vmem>>, vector<128x128xbf16>
    %c0_4 = arith.constant 0 : index
    %c0_5 = arith.constant 0 : index
    %6 = vector.load %arg8[%c0_4, %c0_5] : memref<8x128xf32, #tpu.memory_space<vmem>>, vector<8x128xf32>
    %cst = arith.constant dense<0.000000e+00> : vector<8x128xf32>
    %7 = tpu.matmul %4, %5, %cst {dimension_numbers = #tpu.dot_dimension_numbers<[1], [0], [0], [1], [0, 0, 1, 1], [], []>} : vector<8x128xbf16>, vector<128x128xbf16>, vector<8x128xf32> -> vector<8x128xf32>
    %8 = arith.addf %6, %7 : vector<8x128xf32>
    %c0_6 = arith.constant 0 : index
    %c0_7 = arith.constant 0 : index
    %9 = vector.load %arg8[%c0_6, %c0_7] : memref<8x128xf32, #tpu.memory_space<vmem>>, vector<8x128xf32>
    tpu.vector_store %arg8[%c0_6, %c0_7], %8 {strides = array<i32>} : memref<8x128xf32, #tpu.memory_space<vmem>>, vector<8x128xf32>,
    %c0_i32_8 = arith.constant 0 : i32
    %10 = arith.cmpi eq, %arg2, %c0_i32_8 : i32
    %11 = arith.extui %10 : i1 to i32
    %c0_i32_9 = arith.constant 0 : i32
    %12 = arith.cmpi ne, %11, %c0_i32_9 : i32
    scf.if %12 {
      %c0_10 = arith.constant 0 : index
      %c0_11 = arith.constant 0 : index
      %13 = vector.load %arg8[%c0_10, %c0_11] : memref<8x128xf32, #tpu.memory_space<vmem>>, vector<8x128xf32>
      %c0_12 = arith.constant 0 : index
      %c0_13 = arith.constant 0 : index
      %14 = vector.load %arg5[%c0_12, %c0_13] : memref<1x128xf32, #tpu.memory_space<vmem>>, vector<1x128xf32>
      %15 = vector.broadcast %14 : vector<1x128xf32> to vector<8x128xf32>
      %16 = arith.mulf %13, %15 : vector<8x128xf32>
      %c0_14 = arith.constant 0 : index
      %c0_15 = arith.constant 0 : index
      %17 = vector.load %arg6[%c0_14, %c0_15] : memref<1x128xf32, #tpu.memory_space<vmem>>, vector<1x128xf32>
      %18 = vector.broadcast %17 : vector<1x128xf32> to vector<8x128xf32>
      %19 = arith.addf %16, %18 : vector<8x128xf32>
      %c0_16 = arith.constant 0 : index
      %c0_17 = arith.constant 0 : index
      %20 = vector.load %arg7[%c0_16, %c0_17] : memref<8x128xf32, #tpu.memory_space<vmem>>, vector<8x128xf32>
      tpu.vector_store %arg7[%c0_16, %c0_17], %19 {strides = array<i32>} : memref<8x128xf32, #tpu.memory_space<vmem>>, vector<8x128xf32>,
    } else {
    }
    return
  }
  func.func @transform_0(%arg0: i32, %arg1: i32, %arg2: i32) -> (i32, i32) {
    %c0_i32 = arith.constant 0 : i32
    return %arg0, %arg2 : i32, i32
  }
  func.func @transform_1(%arg0: i32, %arg1: i32, %arg2: i32) -> (i32, i32) {
    %c0_i32 = arith.constant 0 : i32
    return %arg2, %arg1 : i32, i32
  }
  func.func @transform_2(%arg0: i32, %arg1: i32, %arg2: i32) -> (i32, i32) {
    %c0_i32 = arith.constant 0 : i32
    %c0_i32_0 = arith.constant 0 : i32
    return %c0_i32, %arg1 : i32, i32
  }
  func.func @transform_3(%arg0: i32, %arg1: i32, %arg2: i32) -> (i32, i32) {
    %c0_i32 = arith.constant 0 : i32
    %c0_i32_0 = arith.constant 0 : i32
    return %c0_i32, %arg1 : i32, i32
  }
  func.func @transform_4(%arg0: i32, %arg1: i32, %arg2: i32) -> (i32, i32) {
    %c0_i32 = arith.constant 0 : i32
    return %arg0, %arg1 : i32, i32
  }
}

</mosaic_0001>

<bundles_post_ra>
// kernel: densenet_models_forward.14
= control target key start
LH: loop header
LB: loop body
LE: loop exit
PB: predicated region body
PF: predicated region fallthrough
CT: control target
= control target key end

     0   :  { %s992_s1 = inlined_call_operand.vmem [shape: bf16[256,128], index: 1, kind: input, shape index: {}]   ;;  %s993_s0 = inlined_call_operand.vmem [shape: bf16[128,256], index: 0, kind: input, shape index: {}]   ;;  %s994_s2 = inlined_call_operand.vmem [shape: f32[1,128], index: 2, kind: input, shape index: {}]   ;;  %s995_s3 = inlined_call_operand.vmem [shape: f32[1,128], index: 3, kind: input, shape index: {}]   ;;  %s996_s4 = inlined_call_operand.vmem [shape: bf16[128,128], index: 4, kind: output, shape index: {}]  }
   0x1   :  { %v765_v0 = vld [vmem:[%s992_s1 + $0x40] sm:$0xff]   ;;  %v767_v2 = vld [vmem:[%s992_s1 + $0x48] sm:$0xff]   ;;  %v769_v4 = vld [vmem:[%s992_s1 + $0x50] sm:$0xff]  }
   0x2   :  { %v766_v1 = vld [vmem:[%s992_s1] sm:$0xff]   ;;  %685 = vmatprep.subr.bf16.mxu0 %v765_v0  ;;  %749 = vmatprep.subr.bf16.mxu1 %v765_v0  ;;  %v768_v3 = vld [vmem:[%s992_s1 + $0x8] sm:$0xff]   ;;  %v770_v5 = vld [vmem:[%s992_s1 + $0x10] sm:$0xff]  }
   0x3   :  { %686 = vmatpush3.bf16.msra.mxu0 %v766_v1  ;;  %757 = vmatpush3.bf16.msra.mxu1 %v766_v1  ;;  %v771_v6 = vld [vmem:[%s992_s1 + $0x58] sm:$0xff]   ;;  %v773_v8 = vld [vmem:[%s992_s1 + $0x60] sm:$0xff]   ;;  %v775_v10 = vld [vmem:[%s992_s1 + $0x68] sm:$0xff]  }
   0x4   :  { %687 = vmatprep.subr.bf16.mxu0 %v767_v2  ;;  %750 = vmatprep.subr.bf16.mxu1 %v767_v2  ;;  %v772_v7 = vld [vmem:[%s992_s1 + $0x18] sm:$0xff]   ;;  %v774_v9 = vld [vmem:[%s992_s1 + $0x20] sm:$0xff]   ;;  %v776_v13 = vld [vmem:[%s992_s1 + $0x28] sm:$0xff]  }
   0x5   :  { %v783_v11 = vld [vmem:[%s993_s0 + $0x4] ss:$8 sps:$4 sm:$0xff]   ;;  %v777_v14 = vld [vmem:[%s992_s1 + $0x70] sm:$0xff]   ;;  %v779_v16 = vld [vmem:[%s992_s1 + $0x78] sm:$0xff]  }
   0x6   :  { %v786_v12 = vld [vmem:[%s993_s0 + $0x44] ss:$8 sps:$4 sm:$0xff]   ;;  %310 = vmatprep.mubr.bf16.mxu0 %v783_v11  ;;  %v778_v15 = vld [vmem:[%s992_s1 + $0x30] sm:$0xff]   ;;  %v780_v17 = vld [vmem:[%s992_s1 + $0x38] sm:$0xff]  }
   0x7   :  { %688 = vmatpush3.bf16.msra.mxu0 %v768_v3  ;;  %758 = vmatpush3.bf16.msra.mxu1 %v768_v3  ;;  %v781_v18 = vld [vmem:[%s993_s0] ss:$8 sps:$4 sm:$0xff]   ;;  %v787_v20 = vld [vmem:[%s993_s0 + $0x14] ss:$8 sps:$4 sm:$0xff]   ;;  %v791_v22 = vld [vmem:[%s993_s0 + $0x10] ss:$8 sps:$4 sm:$0xff]  }
   0x8   :  { %689 = vmatprep.subr.bf16.mxu0 %v769_v4  ;;  %751 = vmatprep.subr.bf16.mxu1 %v769_v4  ;;  %v784_v19 = vld [vmem:[%s993_s0 + $0x40] ss:$8 sps:$4 sm:$0xff]   ;;  %v789_v21 = vld [vmem:[%s993_s0 + $0x54] ss:$8 sps:$4 sm:$0xff]   ;;  %v792_v23 = vld [vmem:[%s993_s0 + $0x50] ss:$8 sps:$4 sm:$0xff]  }
   0x9   :  { %342 = vmatprep.mubr.bf16.mxu1 %v786_v12  ;;  %v793_v24 = vld [vmem:[%s993_s0 + $0x24] ss:$8 sps:$4 sm:$0xff]   ;;  %v797_v26 = vld [vmem:[%s993_s0 + $0x20] ss:$8 sps:$4 sm:$0xff]   ;;  %v799_v28 = vld [vmem:[%s993_s0 + $0x34] ss:$8 sps:$4 sm:$0xff]  }
   0xa   :  { %v795_v25 = vld [vmem:[%s993_s0 + $0x64] ss:$8 sps:$4 sm:$0xff]   ;;  %v798_v27 = vld [vmem:[%s993_s0 + $0x60] ss:$8 sps:$4 sm:$0xff]   ;;  %v801_v29 = vld [vmem:[%s993_s0 + $0x74] ss:$8 sps:$4 sm:$0xff]  }
   0xb   :  { %690 = vmatpush3.bf16.msra.mxu0 %v770_v5  ;;  %759 = vmatpush3.bf16.msra.mxu1 %v770_v5  ;;  %v803_v30 = vld [vmem:[%s993_s0 + $0x30] ss:$8 sps:$4 sm:$0xff]   ;;  %v929_v35 = vld [vmem:[%s994_s2] ss:$0 sm:$0xff] }
   0xc   :  { %691 = vmatprep.subr.bf16.mxu0 %v771_v6  ;;  %752 = vmatprep.subr.bf16.mxu1 %v771_v6  ;;  %v804_v31 = vld [vmem:[%s993_s0 + $0x70] ss:$8 sps:$4 sm:$0xff]   ;;  %v934_v41 = vld [vmem:[%s995_s3] ss:$0 sm:$0xff] }
   0xf   :  { %692 = vmatpush3.bf16.msra.mxu0 %v772_v7  ;;  %760 = vmatpush3.bf16.msra.mxu1 %v772_v7 }
  0x10   :  { %693 = vmatprep.subr.bf16.mxu0 %v773_v8  ;;  %753 = vmatprep.subr.bf16.mxu1 %v773_v8 }
  0x13   :  { %694 = vmatpush3.bf16.msra.mxu0 %v774_v9  ;;  %761 = vmatpush3.bf16.msra.mxu1 %v774_v9 }
  0x14   :  { %695 = vmatprep.subr.bf16.mxu0 %v775_v10  ;;  %754 = vmatprep.subr.bf16.mxu1 %v775_v10 }
  0x17   :  { %696 = vmatpush3.bf16.msra.mxu0 %v776_v13  ;;  %762 = vmatpush3.bf16.msra.mxu1 %v776_v13 }
  0x18   :  { %697 = vmatprep.subr.bf16.mxu0 %v777_v14  ;;  %755 = vmatprep.subr.bf16.mxu1 %v777_v14 }
  0x1b   :  { %698 = vmatpush3.bf16.msra.mxu0 %v778_v15  ;;  %763 = vmatpush3.bf16.msra.mxu1 %v778_v15 }
  0x1c   :  { %699 = vmatprep.subr.bf16.mxu0 %v779_v16  ;;  %756 = vmatprep.subr.bf16.mxu1 %v779_v16 }
  0x1f   :  { %700 = vmatpush3.bf16.msra.mxu0 %v780_v17  ;;  %764 = vmatpush3.bf16.msra.mxu1 %v780_v17 }
  0x22   :  { %311 = vmatmul.mubr.bf16.vlgmr.msra.gmra.mrb[0].mxu0 %v781_v18  ;;  %343 = vmatmul.mubr.bf16.vlgmr.msra.gmra.mrb[0].mxu1 %v784_v19 }
  0x23   :  { %318 = vmatprep.mubr.bf16.mxu0 %v787_v20  ;;  %350 = vmatprep.mubr.bf16.mxu1 %v789_v21 }
  0x2a   :  { %319 = vmatmul.mubr.bf16.gmra.mrb[4].mxu0 %v791_v22  ;;  %351 = vmatmul.mubr.bf16.gmra.mrb[4].mxu1 %v792_v23 }
  0x2b   :  { %326 = vmatprep.mubr.bf16.mxu0 %v793_v24  ;;  %358 = vmatprep.mubr.bf16.mxu1 %v795_v25 }
  0x32   :  { %327 = vmatmul.mubr.bf16.gmra.mrb[8].mxu0 %v797_v26  ;;  %359 = vmatmul.mubr.bf16.gmra.mrb[8].mxu1 %v798_v27 }
  0x33   :  { %334 = vmatprep.mubr.bf16.mxu0 %v799_v28  ;;  %366 = vmatprep.mubr.bf16.mxu1 %v801_v29 }
  0x3a   :  { %335 = vmatmul.mubr.bf16.gmra.mrb[12].mxu0 %v803_v30  ;;  %367 = vmatmul.mubr.bf16.gmra.mrb[12].mxu1 %v804_v31 }
  0xf5   :  { %v701_v32 = vpop.f32.mrb[0].mxu0  ;;  %v725_v33 = vpop.f32.mrb[0].mxu1 }
  0xf6   :  { %v702_v34 = vpop.f32.mrb[1].mxu0  ;;  %v726_v36 = vpop.f32.mrb[1].mxu1 }
  0xf7   :  { %v703_v37 = vadd.f32 %v702_v34, %v701_v32  ;;  %v727_v38 = vadd.f32 %v726_v36, %v725_v33  ;;  %v704_v39 = vpop.f32.mrb[2].mxu0  ;;  %v728_v40 = vpop.f32.mrb[2].mxu1 }
  0xf8   :  { %v705_v42 = vpop.f32.mrb[3].mxu0  ;;  %v729_v43 = vpop.f32.mrb[3].mxu1 }
  0xf9   :  { %v433_v44 = vmul.f32 %v703_v37, %v929_v35  ;;  %v441_v45 = vmul.f32 %v727_v38, %v929_v35  ;;  %v706_v46 = vadd.f32 %v705_v42, %v704_v39  ;;  %v730_v47 = vadd.f32 %v729_v43, %v728_v40 }
  0xfb   :  { %v456_v48 = vadd.f32 %v934_v41, %v433_v44  ;;  %v464_v49 = vadd.f32 %v934_v41, %v441_v45  ;;  %v434_v50 = vmul.f32 %v706_v46, %v929_v35  ;;  %v442_v51 = vmul.f32 %v730_v47, %v929_v35 }
  0xfd   :  { %v457_v52 = vadd.f32 %v934_v41, %v434_v50  ;;  %v465_v53 = vadd.f32 %v934_v41, %v442_v51  ;;  %v707_v54 = vpop.f32.mrb[4].mxu0  ;;  %v731_v55 = vpop.f32.mrb[4].mxu1  ;;  %v472_v56 = vmax.f32 %v456_v48, 0.0  ;;  %v480_v57 = vmax.f32 %v464_v49, 0.0 }
  0xfe   :  { %v708_v58 = vpop.f32.mrb[5].mxu0  ;;  %v732_v59 = vpop.f32.mrb[5].mxu1 }
  0xff   :  { %v473_v60 = vmax.f32 %v457_v52, 0.0  ;;  %v481_v61 = vmax.f32 %v465_v53, 0.0  ;;  %v709_v62 = vadd.f32 %v708_v58, %v707_v54  ;;  %v733_v63 = vadd.f32 %v732_v59, %v731_v55  ;;  %v710_v0 = vpop.f32.mrb[6].mxu0  ;;  %v734_v1 = vpop.f32.mrb[6].mxu1 }
 0x100   :  { %v711_v2 = vpop.f32.mrb[7].mxu0  ;;  %v735_v3 = vpop.f32.mrb[7].mxu1 }
 0x101   :  { %v641_v4 = vpack.c.bf16 %v473_v60, %v472_v56  ;;  %v661_v5 = vpack.c.bf16 %v481_v61, %v480_v57  ;;  %v435_v6 = vmul.f32 %v709_v62, %v929_v35  ;;  %v443_v7 = vmul.f32 %v733_v63, %v929_v35 }
 0x102   :  { %v712_v8 = vadd.f32 %v711_v2, %v710_v0  ;;  %v736_v9 = vadd.f32 %v735_v3, %v734_v1 }
 0x103   :  { %642 = vst [vmem:[%s996_s4] sm:$0xff] %v641_v4   ;;  %681 = vst [vmem:[%s996_s4 + $0x20] sm:$0xff] %v661_v5   ;;  %v458_v10 = vadd.f32 %v934_v41, %v435_v6  ;;  %v466_v11 = vadd.f32 %v934_v41, %v443_v7 }
 0x104   :  { %v436_v12 = vmul.f32 %v712_v8, %v929_v35  ;;  %v444_v13 = vmul.f32 %v736_v9, %v929_v35 }
 0x105   :  { %v713_v14 = vpop.f32.mrb[8].mxu0  ;;  %v737_v15 = vpop.f32.mrb[8].mxu1  ;;  %v474_v24 = vmax.f32 %v458_v10, 0.0  ;;  %v482_v25 = vmax.f32 %v466_v11, 0.0 }
 0x106   :  { %v459_v16 = vadd.f32 %v934_v41, %v436_v12  ;;  %v467_v17 = vadd.f32 %v934_v41, %v444_v13  ;;  %v714_v18 = vpop.f32.mrb[9].mxu0  ;;  %v738_v19 = vpop.f32.mrb[9].mxu1 }
 0x107   :  { %v715_v20 = vadd.f32 %v714_v18, %v713_v14  ;;  %v739_v21 = vadd.f32 %v738_v19, %v737_v15  ;;  %v716_v22 = vpop.f32.mrb[10].mxu0  ;;  %v740_v23 = vpop.f32.mrb[10].mxu1 }
 0x108   :  { %v475_v26 = vmax.f32 %v459_v16, 0.0  ;;  %v483_v27 = vmax.f32 %v467_v17, 0.0  ;;  %v717_v28 = vpop.f32.mrb[11].mxu0  ;;  %v741_v29 = vpop.f32.mrb[11].mxu1 }
 0x109   :  { %v437_v30 = vmul.f32 %v715_v20, %v929_v35  ;;  %v445_v31 = vmul.f32 %v739_v21, %v929_v35  ;;  %v718_v32 = vadd.f32 %v717_v28, %v716_v22  ;;  %v742_v33 = vadd.f32 %v741_v29, %v740_v23 }
 0x10a   :  { %v646_v34 = vpack.c.bf16 %v475_v26, %v474_v24  ;;  %v666_v36 = vpack.c.bf16 %v483_v27, %v482_v25 }
 0x10b   :  { %v460_v37 = vadd.f32 %v934_v41, %v437_v30  ;;  %v468_v38 = vadd.f32 %v934_v41, %v445_v31  ;;  %v438_v39 = vmul.f32 %v718_v32, %v929_v35  ;;  %v446_v40 = vmul.f32 %v742_v33, %v929_v35 }
 0x10c   :  { %678 = vst [vmem:[%s996_s4 + $0x8] sm:$0xff] %v646_v34   ;;  %682 = vst [vmem:[%s996_s4 + $0x28] sm:$0xff] %v666_v36  }
 0x10d   :  { %v461_v42 = vadd.f32 %v934_v41, %v438_v39  ;;  %v469_v43 = vadd.f32 %v934_v41, %v446_v40  ;;  %v719_v44 = vpop.f32.mrb[12].mxu0  ;;  %v743_v45 = vpop.f32.mrb[12].mxu1  ;;  %v476_v46 = vmax.f32 %v460_v37, 0.0  ;;  %v484_v47 = vmax.f32 %v468_v38, 0.0 }
 0x10e   :  { %v720_v48 = vpop.f32.mrb[13].mxu0  ;;  %v744_v49 = vpop.f32.mrb[13].mxu1 }
 0x10f   :  { %v477_v50 = vmax.f32 %v461_v42, 0.0  ;;  %v485_v51 = vmax.f32 %v469_v43, 0.0  ;;  %v721_v52 = vadd.f32 %v720_v48, %v719_v44  ;;  %v745_v53 = vadd.f32 %v744_v49, %v743_v45  ;;  %v722_v54 = vpop.f32.mrb[14].mxu0  ;;  %v746_v55 = vpop.f32.mrb[14].mxu1 }
 0x110   :  { %v723_v56 = vpop.f32.mrb[15].mxu0  ;;  %v747_v57 = vpop.f32.mrb[15].mxu1 }
 0x111   :  { %v651_v58 = vpack.c.bf16 %v477_v50, %v476_v46  ;;  %v671_v59 = vpack.c.bf16 %v485_v51, %v484_v47  ;;  %v439_v60 = vmul.f32 %v721_v52, %v929_v35  ;;  %v447_v61 = vmul.f32 %v745_v53, %v929_v35 }
 0x112   :  { %v724_v62 = vadd.f32 %v723_v56, %v722_v54  ;;  %v748_v63 = vadd.f32 %v747_v57, %v746_v55 }
 0x113   :  { %679 = vst [vmem:[%s996_s4 + $0x10] sm:$0xff] %v651_v58   ;;  %683 = vst [vmem:[%s996_s4 + $0x30] sm:$0xff] %v671_v59   ;;  %v462_v0 = vadd.f32 %v934_v41, %v439_v60  ;;  %v470_v1 = vadd.f32 %v934_v41, %v447_v61 }
 0x114   :  { %v440_v2 = vmul.f32 %v724_v62, %v929_v35  ;;  %v448_v3 = vmul.f32 %v748_v63, %v929_v35 }
 0x115   :  { %v478_v6 = vmax.f32 %v462_v0, 0.0  ;;  %v486_v7 = vmax.f32 %v470_v1, 0.0 }
 0x116   :  { %v463_v4 = vadd.f32 %v934_v41, %v440_v2  ;;  %v471_v5 = vadd.f32 %v934_v41, %v448_v3 }
 0x118   :  { %v479_v8 = vmax.f32 %v463_v4, 0.0  ;;  %v487_v9 = vmax.f32 %v471_v5, 0.0 }
 0x11a   :  { %v656_v10 = vpack.c.bf16 %v479_v8, %v478_v6  ;;  %v676_v11 = vpack.c.bf16 %v487_v9, %v486_v7 }
 0x11c   :  { %680 = vst [vmem:[%s996_s4 + $0x18] sm:$0xff] %v656_v10   ;;  %684 = vst [vmem:[%s996_s4 + $0x38] sm:$0xff] %v676_v11  }

// kernel: densenet_models_forward.15
= control target key start
LH: loop header
LB: loop body
LE: loop exit
PB: predicated region body
PF: predicated region fallthrough
CT: control target
= control target key end

     0   :  { %vm45_vm0 = vcmask 125952   ;;  %s365_s0 = inlined_call_operand.vmem [shape: bf16[9,32,16], index: 0, kind: input, shape index: {}]   ;;  %s366_s1 = inlined_call_operand.vmem [shape: bf16[32,16], index: 1, kind: output, shape index: {}]  }
   0x1   :  { %v9_v0 = vld [vmem:[%s365_s0] sm:$0xf]  ;;  %v13_v1 = vld [vmem:[%s365_s0 + $0x10] sm:$0xf]  ;;  %v10_v12 = vld [vmem:[%s365_s0 + $0x4] sm:$0xf] }
   0x2   :  { %v17_v2 = vld [vmem:[%s365_s0 + $0x20] sm:$0xf]  ;;  %v21_v3 = vld [vmem:[%s365_s0 + $0x30] sm:$0xf]  ;;  %v48_v4 = vsel %vm45_vm0, %v9_v0, 4286644096 }
   0x3   :  { %v51_v5 = vsel %vm45_vm0, %v13_v1, 4286644096  ;;  %v55_v6 = vsel %vm45_vm0, %v17_v2, 4286644096  ;;  %v25_v7 = vld [vmem:[%s365_s0 + $0x40] sm:$0xf] }
   0x4   :  { %v53_v8 = vmax.bf16 %v51_v5, %v48_v4  ;;  %v29_v9 = vld [vmem:[%s365_s0 + $0x50] sm:$0xf]  ;;  %v59_v10 = vsel %vm45_vm0, %v21_v3, 4286644096  ;;  %v14_v13 = vld [vmem:[%s365_s0 + $0x14] sm:$0xf] }
   0x5   :  { %v18_v14 = vld [vmem:[%s365_s0 + $0x24] sm:$0xf]  ;;  %v63_v15 = vsel %vm45_vm0, %v25_v7, 4286644096  ;;  %v33_v16 = vld [vmem:[%s365_s0 + $0x60] sm:$0xf] }
   0x6   :  { %v57_v11 = vmax.bf16 %v55_v6, %v53_v8  ;;  %v67_v18 = vsel %vm45_vm0, %v29_v9, 4286644096  ;;  %v22_v19 = vld [vmem:[%s365_s0 + $0x34] sm:$0xf]  ;;  %v83_v20 = vsel %vm45_vm0, %v10_v12, 4286644096 }
   0x7   :  { %v86_v21 = vsel %vm45_vm0, %v14_v13, 4286644096  ;;  %v90_v22 = vsel %vm45_vm0, %v18_v14, 4286644096  ;;  %v37_v23 = vld [vmem:[%s365_s0 + $0x70] sm:$0xf] }
   0x8   :  { %v61_v17 = vmax.bf16 %v59_v10, %v57_v11  ;;  %v41_v24 = vld [vmem:[%s365_s0 + $0x80] sm:$0xf]  ;;  %v26_v26 = vld [vmem:[%s365_s0 + $0x44] sm:$0xf]  ;;  %v88_v27 = vmax.bf16 %v86_v21, %v83_v20  ;;  %v71_v28 = vsel %vm45_vm0, %v33_v16, 4286644096 }
   0x9   :  { %v30_v29 = vld [vmem:[%s365_s0 + $0x54] sm:$0xf]  ;;  %v94_v30 = vsel %vm45_vm0, %v22_v19, 4286644096  ;;  %v11_v33 = vld [vmem:[%s365_s0 + $0x8] sm:$0xf] }
   0xa   :  { %v65_v25 = vmax.bf16 %v63_v15, %v61_v17  ;;  %v92_v32 = vmax.bf16 %v90_v22, %v88_v27  ;;  %v15_v34 = vld [vmem:[%s365_s0 + $0x18] sm:$0xf]  ;;  %v19_v35 = vld [vmem:[%s365_s0 + $0x28] sm:$0xf]  ;;  %v75_v36 = vsel %vm45_vm0, %v37_v23, 4286644096 }
   0xb   :  { %v79_v37 = vsel %vm45_vm0, %v41_v24, 4286644096  ;;  %v98_v38 = vsel %vm45_vm0, %v26_v26, 4286644096  ;;  %v34_v40 = vld [vmem:[%s365_s0 + $0x64] sm:$0xf] }
   0xc   :  { %v69_v31 = vmax.bf16 %v67_v18, %v65_v25  ;;  %v96_v41 = vmax.bf16 %v94_v30, %v92_v32  ;;  %v102_v42 = vsel %vm45_vm0, %v30_v29, 4286644096  ;;  %v23_v43 = vld [vmem:[%s365_s0 + $0x38] sm:$0xf]  ;;  %v118_v44 = vsel %vm45_vm0, %v11_v33, 4286644096 }
   0xd   :  { %v121_v45 = vsel %vm45_vm0, %v15_v34, 4286644096  ;;  %v125_v46 = vsel %vm45_vm0, %v19_v35, 4286644096  ;;  %v38_v48 = vld [vmem:[%s365_s0 + $0x74] sm:$0xf] }
   0xe   :  { %v73_v39 = vmax.bf16 %v71_v28, %v69_v31  ;;  %v42_v49 = vld [vmem:[%s365_s0 + $0x84] sm:$0xf]  ;;  %v100_v50 = vmax.bf16 %v98_v38, %v96_v41  ;;  %v27_v51 = vld [vmem:[%s365_s0 + $0x48] sm:$0xf]  ;;  %v123_v52 = vmax.bf16 %v121_v45, %v118_v44  ;;  %v106_v53 = vsel %vm45_vm0, %v34_v40, 4286644096 }
   0xf   :  { %v31_v54 = vld [vmem:[%s365_s0 + $0x58] sm:$0xf]  ;;  %v129_v55 = vsel %vm45_vm0, %v23_v43, 4286644096  ;;  %v12_v59 = vld [vmem:[%s365_s0 + $0xc] sm:$0xf] }
  0x10   :  { %v77_v47 = vmax.bf16 %v75_v36, %v73_v39  ;;  %v104_v57 = vmax.bf16 %v102_v42, %v100_v50  ;;  %v127_v58 = vmax.bf16 %v125_v46, %v123_v52  ;;  %v16_v60 = vld [vmem:[%s365_s0 + $0x1c] sm:$0xf]  ;;  %v20_v61 = vld [vmem:[%s365_s0 + $0x2c] sm:$0xf]  ;;  %v110_v62 = vsel %vm45_vm0, %v38_v48, 4286644096 }
  0x11   :  { %v114_v63 = vsel %vm45_vm0, %v42_v49, 4286644096  ;;  %v133_v0 = vsel %vm45_vm0, %v27_v51, 4286644096  ;;  %v35_v2 = vld [vmem:[%s365_s0 + $0x68] sm:$0xf] }
  0x12   :  { %v81_v56 = vmax.bf16 %v79_v37, %v77_v47  ;;  %v108_v1 = vmax.bf16 %v106_v53, %v104_v57  ;;  %v131_v3 = vmax.bf16 %v129_v55, %v127_v58  ;;  %v137_v4 = vsel %vm45_vm0, %v31_v54, 4286644096  ;;  %v24_v5 = vld [vmem:[%s365_s0 + $0x3c] sm:$0xf]  ;;  %v39_v10 = vld [vmem:[%s365_s0 + $0x78] sm:$0xf] }
  0x13   :  { %v153_v6 = vsel %vm45_vm0, %v12_v59, 4286644096  ;;  %v156_v7 = vsel %vm45_vm0, %v16_v60, 4286644096  ;;  %v160_v8 = vsel %vm45_vm0, %v20_v61, 4286644096 }
  0x14   :  { %187 = vst.msk [vmem:[%s366_s1] sm:$0xf] %vm45_vm0, %v81_v56  ;;  %v112_v9 = vmax.bf16 %v110_v62, %v108_v1  ;;  %v135_v11 = vmax.bf16 %v133_v0, %v131_v3  ;;  %v28_v12 = vld [vmem:[%s365_s0 + $0x4c] sm:$0xf]  ;;  %v158_v13 = vmax.bf16 %v156_v7, %v153_v6  ;;  %v141_v14 = vsel %vm45_vm0, %v35_v2, 4286644096 }
  0x15   :  { %v164_v15 = vsel %vm45_vm0, %v24_v5, 4286644096  ;;  %v43_v17 = vld [vmem:[%s365_s0 + $0x88] sm:$0xf]  ;;  %v32_v19 = vld [vmem:[%s365_s0 + $0x5c] sm:$0xf] }
  0x16   :  { %v116_v16 = vmax.bf16 %v114_v63, %v112_v9  ;;  %v139_v18 = vmax.bf16 %v137_v4, %v135_v11  ;;  %v162_v20 = vmax.bf16 %v160_v8, %v158_v13  ;;  %v145_v21 = vsel %vm45_vm0, %v39_v10, 4286644096  ;;  %v36_v24 = vld [vmem:[%s365_s0 + $0x6c] sm:$0xf]  ;;  %v40_v29 = vld [vmem:[%s365_s0 + $0x7c] sm:$0xf] }
  0x17   :  { %v168_v22 = vsel %vm45_vm0, %v28_v12, 4286644096  ;;  %v149_v26 = vsel %vm45_vm0, %v43_v17, 4286644096  ;;  %v172_v27 = vsel %vm45_vm0, %v32_v19, 4286644096 }
  0x18   :  { %188 = vst.msk [vmem:[%s366_s1 + $0x4] sm:$0xf] %vm45_vm0, %v116_v16  ;;  %v143_v23 = vmax.bf16 %v141_v14, %v139_v18  ;;  %v166_v25 = vmax.bf16 %v164_v15, %v162_v20  ;;  %v176_v31 = vsel %vm45_vm0, %v36_v24, 4286644096  ;;  %v44_v33 = vld [vmem:[%s365_s0 + $0x8c] sm:$0xf] }
  0x19   :  { %v180_v35 = vsel %vm45_vm0, %v40_v29, 4286644096  ;;  %v184_v37 = vsel %vm45_vm0, %v44_v33, 4286644096 }
  0x1a   :  { %v147_v28 = vmax.bf16 %v145_v21, %v143_v23  ;;  %v170_v30 = vmax.bf16 %v168_v22, %v166_v25 }
  0x1c   :  { %v151_v32 = vmax.bf16 %v149_v26, %v147_v28  ;;  %v174_v34 = vmax.bf16 %v172_v27, %v170_v30 }
  0x1e   :  { %189 = vst.msk [vmem:[%s366_s1 + $0x8] sm:$0xf] %vm45_vm0, %v151_v32  ;;  %v178_v36 = vmax.bf16 %v176_v31, %v174_v34 }
  0x20   :  { %v182_v38 = vmax.bf16 %v180_v35, %v178_v36 }
  0x22   :  { %v186_v39 = vmax.bf16 %v184_v37, %v182_v38 }
  0x24   :  { %190 = vst.msk [vmem:[%s366_s1 + $0xc] sm:$0xf] %vm45_vm0, %v186_v39 }

// kernel: densenet_models_forward.16
= control target key start
LH: loop header
LB: loop body
LE: loop exit
PB: predicated region body
PF: predicated region fallthrough
CT: control target
= control target key end

     0   :  { %s411_s1 = inlined_call_operand.vmem [shape: bf16[128,128], index: 1, kind: input, shape index: {}]   ;;  %s412_s0 = inlined_call_operand.vmem [shape: bf16[32,128], index: 0, kind: input, shape index: {}]   ;;  %s413_s2 = inlined_call_operand.vmem [shape: f32[1,128], index: 2, kind: input, shape index: {}]   ;;  %s414_s3 = inlined_call_operand.vmem [shape: f32[1,128], index: 3, kind: input, shape index: {}]   ;;  %s415_s4 = inlined_call_operand.vmem [shape: f32[1,128], index: 4, kind: input, shape index: {}]   ;;  %s416_s5 = inlined_call_operand.vmem [shape: f32[1,128], index: 5, kind: input, shape index: {}]   ;;  %s417_s6 = inlined_call_operand.vmem [shape: bf16[32,128], index: 6, kind: output, shape index: {}]  }
   0x1   :  { %v320_v0 = vld [vmem:[%s411_s1] sm:$0xff]   ;;  %v321_v1 = vld [vmem:[%s411_s1 + $0x8] sm:$0xff]   ;;  %v322_v2 = vld [vmem:[%s411_s1 + $0x10] sm:$0xff]  }
   0x2   :  { %300 = vmatprep.subr.bf16.mxu0 %v320_v0  ;;  %v323_v3 = vld [vmem:[%s411_s1 + $0x18] sm:$0xff]   ;;  %v271_v4 = vld [vmem:[%s412_s0] sm:$0xff]   ;;  %v288_v9 = vld [vmem:[%s412_s0 + $0x8] sm:$0xff]  }
   0x3   :  { %301 = vmatpush3.bf16.msra.mxu0 %v320_v0  ;;  %v250_v5 = vld [vmem:[%s413_s2] ss:$0 sm:$0xff]  ;;  %v272_v6 = vunpack.c.l.bf16 %v271_v4  ;;  %v273_v7 = vunpack.c.h.bf16 %v271_v4  ;;  %v276_v15 = vunpack.c.l.bf16 %v288_v9  ;;  %v277_v16 = vunpack.c.h.bf16 %v288_v9  ;;  %v325_v19 = vld [vmem:[%s411_s1 + $0x28] sm:$0xff]   ;;  %v326_v23 = vld [vmem:[%s411_s1 + $0x30] sm:$0xff]  }
   0x4   :  { %302 = vmatprep.subr.bf16.mxu0 %v321_v1  ;;  %v251_v8 = vld [vmem:[%s414_s3] ss:$0 sm:$0xff]  ;;  %v327_v26 = vld [vmem:[%s411_s1 + $0x38] sm:$0xff]  }
   0x5   :  { %v47_v10 = vmul.f32 %v272_v6, %v250_v5  ;;  %v48_v11 = vmul.f32 %v273_v7, %v250_v5  ;;  %v324_v12 = vld [vmem:[%s411_s1 + $0x20] sm:$0xff]   ;;  %v49_v21 = vmul.f32 %v276_v15, %v250_v5  ;;  %v50_v22 = vmul.f32 %v277_v16, %v250_v5 }
   0x6   :  { %v260_v30 = vld [vmem:[%s415_s4] ss:$0 sm:$0xff] }
   0x7   :  { %303 = vmatpush3.bf16.msra.mxu0 %v321_v1  ;;  %v58_v13 = vadd.f32 %v251_v8, %v47_v10  ;;  %v59_v14 = vadd.f32 %v251_v8, %v48_v11  ;;  %v60_v24 = vadd.f32 %v251_v8, %v49_v21  ;;  %v61_v25 = vadd.f32 %v251_v8, %v50_v22  ;;  %v261_v32 = vld [vmem:[%s416_s5] ss:$0 sm:$0xff] }
   0x8   :  { %304 = vmatprep.subr.bf16.mxu0 %v322_v2 }
   0x9   :  { %v62_v17 = vmax.f32 %v58_v13, 0.0  ;;  %v63_v18 = vmax.f32 %v59_v14, 0.0  ;;  %v64_v27 = vmax.f32 %v60_v24, 0.0  ;;  %v65_v28 = vmax.f32 %v61_v25, 0.0 }
   0xb   :  { %305 = vmatpush3.bf16.msra.mxu0 %v322_v2  ;;  %v66_v20 = vpack.c.bf16 %v63_v18, %v62_v17  ;;  %v67_v29 = vpack.c.bf16 %v65_v28, %v64_v27 }
   0xc   :  { %306 = vmatprep.subr.bf16.mxu0 %v323_v3 }
   0xd   :  { %316 = vmatprep.mubr.bf16.mxu0 %v66_v20 }
   0xf   :  { %307 = vmatpush3.bf16.msra.mxu0 %v323_v3 }
  0x10   :  { %308 = vmatprep.subr.bf16.mxu0 %v324_v12 }
  0x13   :  { %309 = vmatpush3.bf16.msra.mxu0 %v324_v12 }
  0x14   :  { %310 = vmatprep.subr.bf16.mxu0 %v325_v19 }
  0x17   :  { %311 = vmatpush3.bf16.msra.mxu0 %v325_v19 }
  0x18   :  { %312 = vmatprep.subr.bf16.mxu0 %v326_v23 }
  0x1b   :  { %313 = vmatpush3.bf16.msra.mxu0 %v326_v23 }
  0x1c   :  { %314 = vmatprep.subr.bf16.mxu0 %v327_v26 }
  0x1f   :  { %315 = vmatpush3.bf16.msra.mxu0 %v327_v26 }
  0x22   :  { %317 = vmatmul.mubr.bf16.vlgmr.msra.gmra.mrb[0].mxu0 %v67_v29 }
  0xf5   :  { %v318_v31 = vpop.f32.mrb[0].mxu0 }
  0xf6   :  { %v209_v33 = vmul.f32 %v318_v31, %v260_v30  ;;  %v170_v34 = vpop.f32.mrb[1].mxu0 }
  0xf7   :  { %v207_v35 = vmul.f32 %v260_v30, %v170_v34  ;;  %v319_v36 = vpop.f32.mrb[2].mxu0 }
  0xf8   :  { %v220_v37 = vadd.f32 %v261_v32, %v209_v33  ;;  %v210_v38 = vmul.f32 %v319_v36, %v260_v30  ;;  %v173_v39 = vpop.f32.mrb[3].mxu0 }
  0xf9   :  { %v218_v40 = vadd.f32 %v261_v32, %v207_v35  ;;  %v208_v41 = vmul.f32 %v260_v30, %v173_v39 }
  0xfa   :  { %v221_v42 = vadd.f32 %v261_v32, %v210_v38  ;;  %v224_v44 = vmax.f32 %v220_v37, 0.0 }
  0xfb   :  { %v219_v43 = vadd.f32 %v261_v32, %v208_v41  ;;  %v222_v46 = vmax.f32 %v218_v40, 0.0 }
  0xfc   :  { %v225_v45 = vmax.f32 %v221_v42, 0.0 }
  0xfd   :  { %v223_v47 = vmax.f32 %v219_v43, 0.0 }
  0xfe   :  { %v286_v48 = vpack.c.bf16 %v225_v45, %v224_v44 }
  0xff   :  { %v281_v49 = vpack.c.bf16 %v223_v47, %v222_v46 }
 0x100   :  { %289 = vst [vmem:[%s417_s6 + $0x8] sm:$0xff] %v286_v48  }
 0x101   :  { %282 = vst [vmem:[%s417_s6] sm:$0xff] %v281_v49  }

// kernel: densenet_models_forward.17
= control target key start
LH: loop header
LB: loop body
LE: loop exit
PB: predicated region body
PF: predicated region fallthrough
CT: control target
= control target key end

     0   :  { %s721_s9 = smov 0   ;;  %s723_s10 = smov 0   ;;  %s811_s0 = inlined_call_operand.vmem [shape: bf16[32,384], index: 0, kind: input, shape index: {}]   ;;  %s812_s1 = inlined_call_operand.vmem [shape: bf16[384,128], index: 1, kind: input, shape index: {}]   ;;  %s813_s2 = inlined_call_operand.vmem [shape: bf16[32,128], index: 2, kind: output, shape index: {}]  }
   0x1   :  { %s725_s11 = smov 0   ;;  %s727_s12 = smov 0  }
   0x2   :  { %s729_s13 = smov 0  }
   0x3 LB: > { %s24_s14 = sadd.s32 1, %s699_s12  ;;  %p47_p1 = scmp.ne.s32.totalorder %s691_s10, %s687_s9  ;;  %s703_s13 = sphi %s729_s13, %s12_s13   ;;  %s699_s12 = sphi %s727_s12, %s817_s12   ;;  %s695_s11 = sphi %s725_s11, %s816_s11   ;;  %s691_s10 = sphi %s723_s10, %s815_s10   ;;  %s687_s9 = sphi %s721_s9, %s814_s9  }
   0x4   : > { %p25_p0 = scmp.ge.s32.totalorder %s24_s14, 3  ;;  %p48_p2 = scmp.eq.s32.totalorder %s703_s13, 0 }
   0x5   : > { %s40_s16 = sadd.s32 1, %s691_s10  ;;  %p542_p5 = scmp.ge.s32.totalorder %s703_s13, 3 }
   0x6   : > { %s819_s14 = smov (%p25_p0, %s24_s14), 0  ;;  %p49_p3 = por %p48_p2, %p47_p1 }
   0x7   : > { %s36_s15 = ssub.s32 %s699_s12, %s819_s14  ;;  %129 = sbr.rel (%p542_p5) target bundleno = 21 (0x15), region = 16 }
   0x8   : > { %p38_p4 = scmp.eq.s32.totalorder %s36_s15, 0 }
   0xa   : > { %s756_s17 = scalar_select %p38_p4, %s691_s10, %s40_s16  }
   0xe   : > { %132 = sbr.rel (!%p49_p3) target bundleno = 21 (0x15), region = 20  ;;  %s134_s18 = sand.u32 (%p49_p3), 1, %s691_s10  }
   0xf   : > { %s544_s19 = sshll.u32 (%p49_p3), %s699_s12, 2  ;;  %s543_s20 = sshll.u32 (%p49_p3), %s134_s18, 4 }
  0x10   : > { %s141_s23 = scalar_lea.vmem (%p49_p3), %s811_s0, %s544_s19  ;;  %s136_s24 = scalar_lea.vmem (%p49_p3), [#allocation3], %s543_s20 }
  0x11   : > { %v157_v0 = vld [vmem:[%s141_s23] sm:$0xf] (%p49_p3)  ;;  %v159_v1 = vld [vmem:[%s141_s23 + $0xc] sm:$0xf] (%p49_p3)  ;;  %v161_v2 = vld [vmem:[%s141_s23 + $0x18] sm:$0xf] (%p49_p3) }
  0x12   : > { %158 = vst [vmem:[%s136_s24] sm:$0xf] (%p49_p3), %v157_v0  ;;  %160 = vst [vmem:[%s136_s24 + $0x4] sm:$0xf] (%p49_p3), %v159_v1  ;;  %v163_v3 = vld [vmem:[%s141_s23 + $0x24] sm:$0xf] (%p49_p3) }
  0x13   : > { %162 = vst [vmem:[%s136_s24 + $0x8] sm:$0xf] (%p49_p3), %v161_v2  ;;  %164 = vst [vmem:[%s136_s24 + $0xc] sm:$0xf] (%p49_p3), %v163_v3 }
  0x15 PF: > { %p545_p6 = scmp.ge.s32.totalorder %s703_s13, 1  ;;  %p206_p7 = scmp.lt.s32.totalorder %s703_s13, 4 }
  0x17   : > { %p207_p8 = pnand %p545_p6, %p206_p7 }
  0x18   : > { %s213_s25 = sand.u32 (!%p207_p8), 1, %s687_s9   ;;  %s547_s26 = sshll.u32 (!%p207_p8), %s695_s11, 4 }
  0x19   : > { %210 = sbr.rel (%p207_p8) target bundleno = 300 (0x12c), region = 65  ;;  %s768_s27 = sshll.u32 (!%p207_p8), %s213_s25, 4 }
  0x1a   : > { %p247_p9 = scmp.lt.s32.totalorder (!%p207_p8), %s547_s26, 47  ;;  %s215_s4 = scalar_lea.vmem (!%p207_p8), [#allocation3], %s768_s27 }
  0x1b   : > { %p549_p10 = scmp.ne.s32.totalorder (!%p207_p8), %s695_s11, 0 }
  0x20   : > { %s821_s26 = smov (!%p247_p9, %s547_s26), 47  ;;  %268 = sbr.rel (%p549_p10) target bundleno = 39 (0x27), region = 73 }
  0x21   : > { %s548_s28 = sshll.u32 %s821_s26, 2  ;;  %v705_v4 = vmov (!%p549_p10), 0.0  }
  0x22   : > { %s773_s3 = scalar_lea.vmem %s812_s1, %s548_s28  ;;  %269 = vst [vmem:[#allocation2] sm:$0xff] (!%p549_p10), %v705_v4  ;;  %270 = vst [vmem:[#allocation2 + $0x8] sm:$0xff] (!%p549_p10), %v705_v4 }
  0x23   : > { %271 = vst [vmem:[#allocation2 + $0x10] sm:$0xff] (!%p549_p10), %v705_v4  ;;  %272 = vst [vmem:[#allocation2 + $0x18] sm:$0xff] (!%p549_p10), %v705_v4 }
  0x27 PF: > { %v655_v5 = vld [vmem:[%s773_s3] sm:$0xff]   ;;  %v656_v6 = vld [vmem:[%s773_s3 + $0x8] sm:$0xff]   ;;  %v657_v7 = vld [vmem:[%s773_s3 + $0x10] sm:$0xff]   ;;  %p560_p11 = scmp.ne.s32.totalorder %s695_s11, 2 }
  0x28   : > { %594 = vmatprep.subr.bf16.mxu0 %v655_v5  ;;  %v658_v8 = vld [vmem:[%s773_s3 + $0x18] sm:$0xff]   ;;  %v663_v9 = vld [vmem:[%s215_s4] sm:$0xff]   ;;  %v660_v11 = vld [vmem:[%s773_s3 + $0x28] sm:$0xff]  }
  0x29   : > { %595 = vmatpush3.bf16.msra.mxu0 %v655_v5  ;;  %610 = vmatprep.mubr.bf16.mxu0 %v663_v9  ;;  %v659_v10 = vld [vmem:[%s773_s3 + $0x20] sm:$0xff]   ;;  %v661_v12 = vld [vmem:[%s773_s3 + $0x30] sm:$0xff]   ;;  %v662_v13 = vld [vmem:[%s773_s3 + $0x38] sm:$0xff]  }
  0x2a   : > { %596 = vmatprep.subr.bf16.mxu0 %v656_v6  ;;  %v664_v14 = vld [vmem:[%s215_s4 + $0x8] sm:$0xff]   ;;  %v295_v15 = vld [vmem:[#allocation2 + $0x10] sm:$0xff]  ;;  %v293_v16 = vld [vmem:[#allocation2] sm:$0xff] }
  0x2b   : > { %v296_v18 = vld [vmem:[#allocation2 + $0x18] sm:$0xff]  ;;  %v294_v21 = vld [vmem:[#allocation2 + $0x8] sm:$0xff] }
  0x2d   : > { %597 = vmatpush3.bf16.msra.mxu0 %v656_v6 }
  0x2e   : > { %598 = vmatprep.subr.bf16.mxu0 %v657_v7 }
  0x31   : > { %599 = vmatpush3.bf16.msra.mxu0 %v657_v7 }
  0x32   : > { %600 = vmatprep.subr.bf16.mxu0 %v658_v8 }
  0x35   : > { %601 = vmatpush3.bf16.msra.mxu0 %v658_v8 }
  0x36   : > { %602 = vmatprep.subr.bf16.mxu0 %v659_v10 }
  0x39   : > { %603 = vmatpush3.bf16.msra.mxu0 %v659_v10 }
  0x3a   : > { %604 = vmatprep.subr.bf16.mxu0 %v660_v11 }
  0x3d   : > { %605 = vmatpush3.bf16.msra.mxu0 %v660_v11 }
  0x3e   : > { %606 = vmatprep.subr.bf16.mxu0 %v661_v12 }
  0x41   : > { %607 = vmatpush3.bf16.msra.mxu0 %v661_v12 }
  0x42   : > { %608 = vmatprep.subr.bf16.mxu0 %v662_v13 }
  0x45   : > { %609 = vmatpush3.bf16.msra.mxu0 %v662_v13 }
  0x48   : > { %611 = vmatmul.mubr.bf16.vlgmr.msra.gmra.mrb[0].mxu0 %v664_v14 }
 0x11b   : > { %v612_v17 = vpop.f32.mrb[0].mxu0  ;;  %417 = sbr.rel (%p560_p11) target bundleno = 300 (0x12c), region = 77 }
 0x11c   : > { %v408_v19 = vadd.f32 %v612_v17, %v295_v15  ;;  %v391_v20 = vpop.f32.mrb[1].mxu0 }
 0x11d   : > { %v406_v22 = vadd.f32 %v391_v20, %v293_v16  ;;  %v613_v23 = vpop.f32.mrb[2].mxu0 }
 0x11e   : > { %412 = vst [vmem:[#allocation2 + $0x10] sm:$0xff] %v408_v19  ;;  %v409_v24 = vadd.f32 %v613_v23, %v296_v18  ;;  %v394_v25 = vpop.f32.mrb[3].mxu0 }
 0x11f   : > { %410 = vst [vmem:[#allocation2] sm:$0xff] %v406_v22  ;;  %v407_v26 = vadd.f32 %v394_v25, %v294_v21 }
 0x120   : > { %413 = vst [vmem:[#allocation2 + $0x18] sm:$0xff] %v409_v24 }
 0x121   : > { %411 = vst [vmem:[#allocation2 + $0x8] sm:$0xff] %v407_v26 }
 0x125   : > { %v420_v29 = vld [vmem:[#allocation2 + $0x10] sm:$0xff] }
 0x126   : > { %v418_v27 = vld [vmem:[#allocation2] sm:$0xff] }
 0x127   : > { %v421_v31 = vld [vmem:[#allocation2 + $0x18] sm:$0xff] }
 0x128   : > { %v419_v28 = vld [vmem:[#allocation2 + $0x8] sm:$0xff]  ;;  %v581_v32 = vpack.c.bf16 %v421_v31, %v420_v29 }
 0x129   : > { %v576_v30 = vpack.c.bf16 %v419_v28, %v418_v27 }
 0x12a   : > { %583 = vst [vmem:[%s813_s2 + $0x8] sm:$0xff] %v581_v32  }
 0x12b   : > { %577 = vst [vmem:[%s813_s2] sm:$0xff] %v576_v30  }
 0x12c PF: > { %s12_s13 = sadd.s32 1, %s703_s13   ;;  %s814_s9 = smov %s691_s10 }
 0x12d   : > { %p9_p12 = scmp.ge.s32.totalorder %s12_s13, 5   ;;  %s815_s10 = smov %s756_s17 }
 0x12e   : > { %s816_s11 = smov %s699_s12  ;;  %s817_s12 = smov %s819_s14 }
 0x12f   :  { %11 = sbr.rel (!%p9_p12) target bundleno = 3 (0x3), region = 115 }

// kernel: densenet_models_forward.20
= control target key start
LH: loop header
LB: loop body
LE: loop exit
PB: predicated region body
PF: predicated region fallthrough
CT: control target
= control target key end

     0   :  { %s361_s1 = inlined_call_operand.vmem [shape: bf16[128,128], index: 1, kind: input, shape index: {}]   ;;  %s362_s0 = inlined_call_operand.vmem [shape: bf16[32,128], index: 0, kind: input, shape index: {}]   ;;  %s363_s2 = inlined_call_operand.vmem [shape: f32[1,128], index: 2, kind: input, shape index: {}]   ;;  %s364_s3 = inlined_call_operand.vmem [shape: f32[1,128], index: 3, kind: input, shape index: {}]   ;;  %s365_s4 = inlined_call_operand.vmem [shape: bf16[32,128], index: 4, kind: output, shape index: {}]  }
   0x1   :  { %v286_v0 = vld [vmem:[%s361_s1] sm:$0xff]   ;;  %v287_v1 = vld [vmem:[%s361_s1 + $0x8] sm:$0xff]   ;;  %v288_v2 = vld [vmem:[%s361_s1 + $0x10] sm:$0xff]  }
   0x2   :  { %266 = vmatprep.subr.bf16.mxu0 %v286_v0  ;;  %v289_v3 = vld [vmem:[%s361_s1 + $0x18] sm:$0xff]   ;;  %v237_v4 = vld [vmem:[%s362_s0] sm:$0xff]   ;;  %v254_v9 = vld [vmem:[%s362_s0 + $0x8] sm:$0xff]  }
   0x3   :  { %267 = vmatpush3.bf16.msra.mxu0 %v286_v0  ;;  %v218_v5 = vld [vmem:[%s363_s2] ss:$0 sm:$0xff]  ;;  %v238_v6 = vunpack.c.l.bf16 %v237_v4  ;;  %v239_v7 = vunpack.c.h.bf16 %v237_v4  ;;  %v242_v15 = vunpack.c.l.bf16 %v254_v9  ;;  %v243_v16 = vunpack.c.h.bf16 %v254_v9  ;;  %v291_v19 = vld [vmem:[%s361_s1 + $0x28] sm:$0xff]   ;;  %v292_v23 = vld [vmem:[%s361_s1 + $0x30] sm:$0xff]  }
   0x4   :  { %268 = vmatprep.subr.bf16.mxu0 %v287_v1  ;;  %v219_v8 = vld [vmem:[%s364_s3] ss:$0 sm:$0xff]  ;;  %v293_v26 = vld [vmem:[%s361_s1 + $0x38] sm:$0xff]  }
   0x5   :  { %v41_v10 = vmul.f32 %v238_v6, %v218_v5  ;;  %v42_v11 = vmul.f32 %v239_v7, %v218_v5  ;;  %v290_v12 = vld [vmem:[%s361_s1 + $0x20] sm:$0xff]   ;;  %v43_v21 = vmul.f32 %v242_v15, %v218_v5  ;;  %v44_v22 = vmul.f32 %v243_v16, %v218_v5 }
   0x7   :  { %269 = vmatpush3.bf16.msra.mxu0 %v287_v1  ;;  %v52_v13 = vadd.f32 %v219_v8, %v41_v10  ;;  %v53_v14 = vadd.f32 %v219_v8, %v42_v11  ;;  %v54_v24 = vadd.f32 %v219_v8, %v43_v21  ;;  %v55_v25 = vadd.f32 %v219_v8, %v44_v22 }
   0x8   :  { %270 = vmatprep.subr.bf16.mxu0 %v288_v2 }
   0x9   :  { %v56_v17 = vmax.f32 %v52_v13, 0.0  ;;  %v57_v18 = vmax.f32 %v53_v14, 0.0  ;;  %v58_v27 = vmax.f32 %v54_v24, 0.0  ;;  %v59_v28 = vmax.f32 %v55_v25, 0.0 }
   0xb   :  { %271 = vmatpush3.bf16.msra.mxu0 %v288_v2  ;;  %v60_v20 = vpack.c.bf16 %v57_v18, %v56_v17  ;;  %v61_v29 = vpack.c.bf16 %v59_v28, %v58_v27 }
   0xc   :  { %272 = vmatprep.subr.bf16.mxu0 %v289_v3 }
   0xd   :  { %282 = vmatprep.mubr.bf16.mxu0 %v60_v20 }
   0xf   :  { %273 = vmatpush3.bf16.msra.mxu0 %v289_v3 }
  0x10   :  { %274 = vmatprep.subr.bf16.mxu0 %v290_v12 }
  0x13   :  { %275 = vmatpush3.bf16.msra.mxu0 %v290_v12 }
  0x14   :  { %276 = vmatprep.subr.bf16.mxu0 %v291_v19 }
  0x17   :  { %277 = vmatpush3.bf16.msra.mxu0 %v291_v19 }
  0x18   :  { %278 = vmatprep.subr.bf16.mxu0 %v292_v23 }
  0x1b   :  { %279 = vmatpush3.bf16.msra.mxu0 %v292_v23 }
  0x1c   :  { %280 = vmatprep.subr.bf16.mxu0 %v293_v26 }
  0x1f   :  { %281 = vmatpush3.bf16.msra.mxu0 %v293_v26 }
  0x22   :  { %283 = vmatmul.mubr.bf16.vlgmr.msra.gmra.mrb[0].mxu0 %v61_v29 }
  0xf5   :  { %v284_v30 = vpop.f32.mrb[0].mxu0 }
  0xf6   :  { %v164_v31 = vpop.f32.mrb[1].mxu0 }
  0xf7   :  { %v285_v32 = vpop.f32.mrb[2].mxu0 }
  0xf8   :  { %v252_v33 = vpack.c.bf16 %v285_v32, %v284_v30  ;;  %v167_v34 = vpop.f32.mrb[3].mxu0 }
  0xf9   :  { %v247_v35 = vpack.c.bf16 %v167_v34, %v164_v31 }
  0xfa   :  { %255 = vst [vmem:[%s365_s4 + $0x8] sm:$0xff] %v252_v33  }
  0xfb   :  { %248 = vst [vmem:[%s365_s4] sm:$0xff] %v247_v35  }

// kernel: densenet_models_forward.21
= control target key start
LH: loop header
LB: loop body
LE: loop exit
PB: predicated region body
PF: predicated region fallthrough
CT: control target
= control target key end

     0   :  { %vm16_vm0 = vcmask 130048   ;;  %vm27_vm1 = vcmask 125952   ;;  %s61_s0 = inlined_call_operand.vmem [shape: bf16[4,8,16], index: 0, kind: input, shape index: {}]   ;;  %s62_s1 = inlined_call_operand.vmem [shape: bf16[8,16], index: 1, kind: output, shape index: {}]  }
   0x1   :  { %v34_v0 = vld [vmem:[%s61_s0] sm:$0xff]   ;;  %v41_v1 = vld [vmem:[%s61_s0 + $0x8] sm:$0xff]  }
   0x2   :  { %v35_v2 = vunpack.c.l.bf16 %v34_v0  ;;  %v36_v3 = vunpack.c.h.bf16 %v34_v0  ;;  %v39_v4 = vunpack.c.l.bf16 %v41_v1  ;;  %v40_v5 = vunpack.c.h.bf16 %v41_v1 }
   0x4   :  { %v17_v6 = vsel %vm16_vm0, %v35_v2, 0.0  ;;  %v18_v7 = vsel %vm16_vm0, %v36_v3, 0.0  ;;  %v20_v8 = vsel %vm16_vm0, %v39_v4, 0.0  ;;  %v22_v10 = vsel %vm16_vm0, %v40_v5, 0.0 }
   0x5   :  { %v19_v9 = vadd.f32 %v18_v7, %v17_v6 }
   0x7   :  { %v21_v11 = vadd.f32 %v20_v8, %v19_v9 }
   0x9   :  { %v23_v12 = vadd.f32 %v22_v10, %v21_v11 }
   0xb   :  { %v25_v13 = vmul.f32 0.25, %v23_v12 }
   0xd   :  { %v26_v14 = vpack.c.bf16 %v25_v13, %v25_v13 }
   0xf   :  { %28 = vst.msk [vmem:[%s62_s1] sm:$0xf] %vm27_vm1, %v26_v14 }

// kernel: densenet_models_forward.22
= control target key start
LH: loop header
LB: loop body
LE: loop exit
PB: predicated region body
PF: predicated region fallthrough
CT: control target
= control target key end

     0   :  { %v234_v0 = vmov 0.0   ;;  %vm235_vm0 = vmmov 0   ;;  %s313_s1 = inlined_call_operand.vmem [shape: bf16[128,128], index: 1, kind: input, shape index: {}]   ;;  %s314_s0 = inlined_call_operand.vmem [shape: bf16[8,128], index: 0, kind: input, shape index: {}]   ;;  %s315_s2 = inlined_call_operand.vmem [shape: f32[1,128], index: 2, kind: input, shape index: {}]   ;;  %s316_s3 = inlined_call_operand.vmem [shape: f32[1,128], index: 3, kind: input, shape index: {}]   ;;  %s317_s4 = inlined_call_operand.vmem [shape: f32[1,128], index: 4, kind: input, shape index: {}]   ;;  %s318_s5 = inlined_call_operand.vmem [shape: f32[1,128], index: 5, kind: input, shape index: {}]   ;;  %s319_s6 = inlined_call_operand.vmem [shape: bf16[8,128], index: 6, kind: output, shape index: {}]  }
   0x1   :  { %204 = vmatprep.subr.bf16.mxu0 %v234_v0  ;;  %v226_v1 = vld [vmem:[%s313_s1] sm:$0xff]   ;;  %220 = vmatprep.mubr.msk.bf16.mxu0 %vm235_vm0, %v234_v0  ;;  %v227_v2 = vld [vmem:[%s313_s1 + $0x8] sm:$0xff]   ;;  %v228_v3 = vld [vmem:[%s313_s1 + $0x10] sm:$0xff]  }
   0x2   :  { %205 = vmatpush3.bf16.msra.mxu0 %v226_v1  ;;  %v229_v4 = vld [vmem:[%s313_s1 + $0x18] sm:$0xff]   ;;  %v29_v5 = vld [vmem:[%s314_s0] sm:$0xf]  ;;  %v231_v10 = vld [vmem:[%s313_s1 + $0x28] sm:$0xff]  }
   0x3   :  { %206 = vmatprep.subr.bf16.mxu0 %v234_v0  ;;  %v30_v6 = vunpack.c.l.bf16 %v29_v5  ;;  %v230_v7 = vld [vmem:[%s313_s1 + $0x20] sm:$0xff]   ;;  %v232_v13 = vld [vmem:[%s313_s1 + $0x30] sm:$0xff]   ;;  %v233_v15 = vld [vmem:[%s313_s1 + $0x38] sm:$0xff]  }
   0x4   :  { %v183_v8 = vld [vmem:[%s315_s2] ss:$0 sm:$0xff] }
   0x5   :  { %v38_v9 = vmul.f32 %v183_v8, %v30_v6  ;;  %v184_v11 = vld [vmem:[%s316_s3] ss:$0 sm:$0xff] }
   0x6   :  { %207 = vmatpush3.bf16.msra.mxu0 %v227_v2  ;;  %v193_v17 = vld [vmem:[%s317_s4] ss:$0 sm:$0xff] }
   0x7   :  { %208 = vmatprep.subr.bf16.mxu0 %v234_v0  ;;  %v46_v12 = vadd.f32 %v184_v11, %v38_v9  ;;  %v194_v19 = vld [vmem:[%s318_s5] ss:$0 sm:$0xff] }
   0x9   :  { %v47_v14 = vmax.f32 %v46_v12, 0.0 }
   0xa   :  { %209 = vmatpush3.bf16.msra.mxu0 %v228_v3 }
   0xb   :  { %210 = vmatprep.subr.bf16.mxu0 %v234_v0  ;;  %v48_v16 = vpack.c.bf16 %v47_v14, %v47_v14 }
   0xe   :  { %211 = vmatpush3.bf16.msra.mxu0 %v229_v4 }
   0xf   :  { %212 = vmatprep.subr.bf16.mxu0 %v234_v0 }
  0x12   :  { %213 = vmatpush3.bf16.msra.mxu0 %v230_v7 }
  0x13   :  { %214 = vmatprep.subr.bf16.mxu0 %v234_v0 }
  0x16   :  { %215 = vmatpush3.bf16.msra.mxu0 %v231_v10 }
  0x17   :  { %216 = vmatprep.subr.bf16.mxu0 %v234_v0 }
  0x1a   :  { %217 = vmatpush3.bf16.msra.mxu0 %v232_v13 }
  0x1b   :  { %218 = vmatprep.subr.bf16.mxu0 %v234_v0 }
  0x1e   :  { %219 = vmatpush3.bf16.msra.mxu0 %v233_v15 }
  0x21   :  { %221 = vmatmul.mubr.bf16.vlgmr.msra.gmra.mrb[0].mxu0 %v48_v16 }
  0xf4   :  { %v148_v18 = vpop.f32.mrb[0].mxu0 }
  0xf5   :  { %v167_v20 = vmul.f32 %v193_v17, %v148_v18  ;;  %v222_v21 = vpop.f32.mrb[1].mxu0 }
  0xf6   :  { %v151_v22 = vpop.f32.mrb[2].mxu0 }
  0xf7   :  { %v175_v23 = vadd.f32 %v194_v19, %v167_v20  ;;  %v223_v24 = vpop.f32.mrb[3].mxu0 }
  0xf9   :  { %v176_v25 = vmax.f32 %v175_v23, 0.0 }
  0xfb   :  { %v177_v26 = vpack.c.bf16 %v176_v25, %v176_v25 }
  0xfd   :  { %178 = vst [vmem:[%s319_s6] sm:$0xf] %v177_v26 }

// kernel: densenet_models_forward.23
= control target key start
LH: loop header
LB: loop body
LE: loop exit
PB: predicated region body
PF: predicated region fallthrough
CT: control target
= control target key end

     0   :  { %s553_s9 = smov 0   ;;  %s555_s10 = smov 0   ;;  %s599_s0 = inlined_call_operand.vmem [shape: bf16[8,384], index: 0, kind: input, shape index: {}]   ;;  %s600_s1 = inlined_call_operand.vmem [shape: bf16[384,128], index: 1, kind: input, shape index: {}]   ;;  %s601_s2 = inlined_call_operand.vmem [shape: bf16[8,128], index: 2, kind: output, shape index: {}]  }
   0x1   :  { %s557_s11 = smov 0  }
   0x2 LB: > { %s24_s12 = sadd.s32 1, %s529_s10  ;;  %p430_p0 = scmp.ge.s32.totalorder %s533_s11, 1  ;;  %s533_s11 = sphi %s557_s11, %s12_s11   ;;  %s529_s10 = sphi %s555_s10, %s603_s10   ;;  %s525_s9 = sphi %s553_s9, %s602_s9  }
   0x3   : > { %p25_p1 = scmp.ge.s32.totalorder %s24_s12, 3  ;;  %p154_p2 = scmp.lt.s32.totalorder %s533_s11, 4 }
   0x5   : > { %s605_s12 = smov (%p25_p1, %s24_s12), 0  ;;  %p155_p3 = pnand %p430_p0, %p154_p2 }
   0x6   : > { %p191_p4 = scmp.lt.s32.totalorder (!%p155_p3), %s525_s9, 2  ;;  %s432_s13 = sshll.u32 (!%p155_p3), %s525_s9, 4 }
   0x7   : > { %158 = sbr.rel (%p155_p3) target bundleno = 280 (0x118), region = 28  ;;  %p198_p5 = scmp.lt.s32.totalorder (!%p155_p3), %s432_s13, 47 }
   0x8   : > { %p434_p6 = scmp.ne.s32.totalorder (!%p155_p3), %s525_s9, 0 }
   0xe   : > { %s192_s14 = scalar_select %p191_p4, %s525_s9, 2 }
   0xf   : > { %s607_s13 = smov (!%p198_p5, %s432_s13), 47  ;;  %217 = sbr.rel (%p434_p6) target bundleno = 22 (0x16), region = 32 }
  0x10   : > { %s431_s15 = sshll.u32 %s192_s14, 2  ;;  %s433_s19 = sshll.u32 %s607_s13, 2  ;;  %v535_v0 = vmov (!%p434_p6), 0.0  }
  0x11   : > { %s579_s18 = scalar_lea.vmem %s599_s0, %s431_s15  ;;  %s204_s22 = scalar_lea.vmem %s600_s1, %s433_s19  ;;  %218 = vst [vmem:[#allocation2] sm:$0xff] (!%p434_p6), %v535_v0 }
  0x16 PF: > { %v503_v1 = vld [vmem:[%s204_s22] sm:$0xff]   ;;  %v536_v2 = vmov 0.0   ;;  %v504_v3 = vld [vmem:[%s204_s22 + $0x8] sm:$0xff]   ;;  %vm537_vm0 = vmmov 0   ;;  %v505_v4 = vld [vmem:[%s204_s22 + $0x10] sm:$0xff]   ;;  %p443_p7 = scmp.ne.s32.totalorder %s525_s9, 2 }
  0x17   : > { %456 = vmatprep.subr.bf16.mxu0 %v536_v2  ;;  %472 = vmatprep.mubr.msk.bf16.mxu0 %vm537_vm0, %v536_v2  ;;  %v506_v5 = vld [vmem:[%s204_s22 + $0x18] sm:$0xff]   ;;  %v507_v6 = vld [vmem:[%s204_s22 + $0x20] sm:$0xff]   ;;  %v508_v7 = vld [vmem:[%s204_s22 + $0x28] sm:$0xff]  }
  0x18   : > { %457 = vmatpush3.bf16.msra.mxu0 %v503_v1  ;;  %v509_v8 = vld [vmem:[%s204_s22 + $0x30] sm:$0xff]   ;;  %v510_v9 = vld [vmem:[%s204_s22 + $0x38] sm:$0xff]   ;;  %v219_v10 = vld [vmem:[%s579_s18] sm:$0xf] }
  0x19   : > { %458 = vmatprep.subr.bf16.mxu0 %v536_v2  ;;  %v236_v11 = vld [vmem:[#allocation2] sm:$0xff] }
  0x1c   : > { %459 = vmatpush3.bf16.msra.mxu0 %v504_v3 }
  0x1d   : > { %460 = vmatprep.subr.bf16.mxu0 %v536_v2 }
  0x20   : > { %461 = vmatpush3.bf16.msra.mxu0 %v505_v4 }
  0x21   : > { %462 = vmatprep.subr.bf16.mxu0 %v536_v2 }
  0x24   : > { %463 = vmatpush3.bf16.msra.mxu0 %v506_v5 }
  0x25   : > { %464 = vmatprep.subr.bf16.mxu0 %v536_v2 }
  0x28   : > { %465 = vmatpush3.bf16.msra.mxu0 %v507_v6 }
  0x29   : > { %466 = vmatprep.subr.bf16.mxu0 %v536_v2 }
  0x2c   : > { %467 = vmatpush3.bf16.msra.mxu0 %v508_v7 }
  0x2d   : > { %468 = vmatprep.subr.bf16.mxu0 %v536_v2 }
  0x30   : > { %469 = vmatpush3.bf16.msra.mxu0 %v509_v8 }
  0x31   : > { %470 = vmatprep.subr.bf16.mxu0 %v536_v2 }
  0x34   : > { %471 = vmatpush3.bf16.msra.mxu0 %v510_v9 }
  0x37   : > { %473 = vmatmul.mubr.bf16.vlgmr.msra.gmra.mrb[0].mxu0 %v219_v10 }
 0x107   : > { %330 = sbr.rel (%p443_p7) target bundleno = 280 (0x118), region = 36 }
 0x10a   : > { %v319_v12 = vpop.f32.mrb[0].mxu0 }
 0x10b   : > { %v325_v13 = vadd.f32 %v319_v12, %v236_v11  ;;  %v474_v14 = vpop.f32.mrb[1].mxu0 }
 0x10c   : > { %v322_v15 = vpop.f32.mrb[2].mxu0 }
 0x10d   : > { %326 = vst [vmem:[#allocation2] sm:$0xff] %v325_v13  ;;  %v475_v16 = vpop.f32.mrb[3].mxu0 }
 0x114   : > { %v331_v17 = vld [vmem:[#allocation2] sm:$0xff] }
 0x115   : > { %v332_v18 = vpack.c.bf16 %v331_v17, %v331_v17 }
 0x117   : > { %333 = vst [vmem:[%s601_s2] sm:$0xf] %v332_v18 }
 0x118 PF: > { %s12_s11 = sadd.s32 1, %s533_s11   ;;  %s602_s9 = smov %s529_s10 }
 0x119   : > { %p9_p8 = scmp.ge.s32.totalorder %s12_s11, 5   ;;  %s603_s10 = smov %s605_s12 }
 0x11b   :  { %11 = sbr.rel (!%p9_p8) target bundleno = 2 (0x2), region = 69 }

// kernel: densenet_models_forward.26
= control target key start
LH: loop header
LB: loop body
LE: loop exit
PB: predicated region body
PF: predicated region fallthrough
CT: control target
= control target key end

     0   :  { %vm16_vm0 = vcmask 261120   ;;  %s59_s0 = inlined_call_operand.vmem [shape: bf16[4,8,32], index: 0, kind: input, shape index: {}]   ;;  %s60_s1 = inlined_call_operand.vmem [shape: f32[8,32], index: 1, kind: output, shape index: {}]  }
   0x1   :  { %v32_v0 = vld [vmem:[%s59_s0] sm:$0xff]   ;;  %v39_v1 = vld [vmem:[%s59_s0 + $0x8] sm:$0xff]  }
   0x2   :  { %v33_v2 = vunpack.c.l.bf16 %v32_v0  ;;  %v34_v3 = vunpack.c.h.bf16 %v32_v0  ;;  %v37_v4 = vunpack.c.l.bf16 %v39_v1  ;;  %v38_v5 = vunpack.c.h.bf16 %v39_v1 }
   0x4   :  { %v17_v6 = vsel %vm16_vm0, %v33_v2, 0.0  ;;  %v18_v7 = vsel %vm16_vm0, %v34_v3, 0.0  ;;  %v20_v8 = vsel %vm16_vm0, %v37_v4, 0.0  ;;  %v22_v10 = vsel %vm16_vm0, %v38_v5, 0.0 }
   0x5   :  { %v19_v9 = vadd.f32 %v18_v7, %v17_v6 }
   0x7   :  { %v21_v11 = vadd.f32 %v20_v8, %v19_v9 }
   0x9   :  { %v23_v12 = vadd.f32 %v22_v10, %v21_v11 }
   0xb   :  { %v25_v13 = vmul.f32 0.25, %v23_v12 }
   0xd   :  { %26 = vst.msk [vmem:[%s60_s1] sm:$0xff] %vm16_vm0, %v25_v13 }

// kernel: densenet_models_forward.27
= control target key start
LH: loop header
LB: loop body
LE: loop exit
PB: predicated region body
PF: predicated region fallthrough
CT: control target
= control target key end

     0   :  { %v206_v0 = vmov 0.0   ;;  %vm207_vm0 = vmmov 0   ;;  %s269_s1 = inlined_call_operand.vmem [shape: bf16[128,128], index: 1, kind: input, shape index: {}]   ;;  %s270_s0 = inlined_call_operand.vmem [shape: f32[8,128], index: 0, kind: input, shape index: {}]   ;;  %s271_s2 = inlined_call_operand.vmem [shape: f32[1,128], index: 2, kind: input, shape index: {}]   ;;  %s272_s3 = inlined_call_operand.vmem [shape: f32[1,128], index: 3, kind: input, shape index: {}]   ;;  %s273_s4 = inlined_call_operand.vmem [shape: f32[8,128], index: 4, kind: output, shape index: {}]  }
   0x1   :  { %176 = vmatprep.subr.bf16.mxu0 %v206_v0  ;;  %v198_v1 = vld [vmem:[%s269_s1] sm:$0xff]   ;;  %192 = vmatprep.mubr.msk.bf16.mxu0 %vm207_vm0, %v206_v0  ;;  %v199_v2 = vld [vmem:[%s269_s1 + $0x8] sm:$0xff]   ;;  %v200_v3 = vld [vmem:[%s269_s1 + $0x10] sm:$0xff]  }
   0x2   :  { %177 = vmatpush3.bf16.msra.mxu0 %v198_v1  ;;  %v201_v4 = vld [vmem:[%s269_s1 + $0x18] sm:$0xff]   ;;  %v202_v5 = vld [vmem:[%s269_s1 + $0x20] sm:$0xff]   ;;  %v203_v6 = vld [vmem:[%s269_s1 + $0x28] sm:$0xff]  }
   0x3   :  { %178 = vmatprep.subr.bf16.mxu0 %v206_v0  ;;  %v204_v7 = vld [vmem:[%s269_s1 + $0x30] sm:$0xff]   ;;  %v205_v8 = vld [vmem:[%s269_s1 + $0x38] sm:$0xff]   ;;  %v23_v9 = vld [vmem:[%s270_s0] sm:$0xff] }
   0x4   :  { %v24_v10 = vpack.c.bf16 %v23_v9, %v23_v9  ;;  %v165_v11 = vld [vmem:[%s271_s2] ss:$0 sm:$0xff] }
   0x5   :  { %v166_v13 = vld [vmem:[%s272_s3] ss:$0 sm:$0xff] }
   0x6   :  { %179 = vmatpush3.bf16.msra.mxu0 %v199_v2 }
   0x7   :  { %180 = vmatprep.subr.bf16.mxu0 %v206_v0 }
   0xa   :  { %181 = vmatpush3.bf16.msra.mxu0 %v200_v3 }
   0xb   :  { %182 = vmatprep.subr.bf16.mxu0 %v206_v0 }
   0xe   :  { %183 = vmatpush3.bf16.msra.mxu0 %v201_v4 }
   0xf   :  { %184 = vmatprep.subr.bf16.mxu0 %v206_v0 }
  0x12   :  { %185 = vmatpush3.bf16.msra.mxu0 %v202_v5 }
  0x13   :  { %186 = vmatprep.subr.bf16.mxu0 %v206_v0 }
  0x16   :  { %187 = vmatpush3.bf16.msra.mxu0 %v203_v6 }
  0x17   :  { %188 = vmatprep.subr.bf16.mxu0 %v206_v0 }
  0x1a   :  { %189 = vmatpush3.bf16.msra.mxu0 %v204_v7 }
  0x1b   :  { %190 = vmatprep.subr.bf16.mxu0 %v206_v0 }
  0x1e   :  { %191 = vmatpush3.bf16.msra.mxu0 %v205_v8 }
  0x21   :  { %193 = vmatmul.mubr.bf16.vlgmr.msra.gmra.mrb[0].mxu0 %v24_v10 }
  0xf4   :  { %v124_v12 = vpop.f32.mrb[0].mxu0 }
  0xf5   :  { %v143_v14 = vmul.f32 %v165_v11, %v124_v12  ;;  %v194_v15 = vpop.f32.mrb[1].mxu0 }
  0xf6   :  { %v127_v16 = vpop.f32.mrb[2].mxu0 }
  0xf7   :  { %v151_v17 = vadd.f32 %v166_v13, %v143_v14  ;;  %v195_v18 = vpop.f32.mrb[3].mxu0 }
  0xf9   :  { %152 = vst [vmem:[%s273_s4] sm:$0xff] %v151_v17 }

</bundles_post_ra>
